<compile_context>
chip_gen: v6e
topology: v6e:2x2x1
jax: 0.10.0
libtpu: 0.0.40
codegen_flags: <defaults>
</compile_context>

<pallas_src>
import math

import jax
import jax.numpy as jnp
from jax.experimental import pallas as pl
from jax.experimental.pallas import tpu as pltpu

# ----------------------------- config ---------------------------------------
B = 2
T = 8                                  # block_size == max_seq_length
N_HEAD = 4
N_QUERY_GROUPS = 2
HEAD_SIZE = 8
N_EMBD = N_HEAD * HEAD_SIZE            # 32
INTERMEDIATE = 64
BIT = 4
NORM_EPS = 1e-5
Q_PER_KV = N_HEAD // N_QUERY_GROUPS    # 2
QKV_OUT = (N_HEAD + 2 * N_QUERY_GROUPS) * HEAD_SIZE   # 64
LEVELS = float(2 ** BIT - 1)
GROUP_W = (Q_PER_KV + 2) * HEAD_SIZE   # 32 channels per GQA group in qkv

N_STACK_Q = B * N_QUERY_GROUPS * Q_PER_KV   # 8 stacked query heads
N_STACK_K = B * N_QUERY_GROUPS              # 4 stacked kv groups
NQ_ROWS = N_STACK_Q * T                     # 64
NK_ROWS = N_STACK_K * T                     # 32
HALF = HEAD_SIZE // 2


# --------------------------- kernel helpers ----------------------------------
def _rmsnorm(x, w_row, eps):
    # MyNorm: x * rsqrt(mean(x*x, -1) + eps) * weight
    ms = jnp.mean(x * x, axis=-1, keepdims=True)
    return w_row * (x * jax.lax.rsqrt(ms + eps))


def _quant_relu(x, inv_alpha, out_scale):
    # QuantReLU fwd: relu -> /alpha -> clamp[0,1] -> round to 2^b-1 levels -> *alpha.
    # 1/alpha and alpha/levels are precomputed host-side (SMEM scalars).
    return jnp.round(jnp.clip(jnp.maximum(x, 0.0) * inv_alpha, 0.0, 1.0)
                     * LEVELS) * out_scale


def _swap_halves(u):
    # [u1 | u2] -> [u2 | u1]  (GPT-NeoX RoPE half-swap)
    return jnp.concatenate([u[:, HALF:], u[:, :HALF]], axis=-1)


# --------------------------- fused Block kernel ------------------------------
def _block_kernel(x_ref, vecs_ref, attn_w_ref, bias2_ref, proj_w_ref,
                  fc_w_ref, mlp_proj_w_ref, rope_ref, maskscale_ref,
                  scal_ref, o_ref, y_scr):
    x = x_ref[...]                         # (B*T, C) f32

    norm1_w = vecs_ref[0:1, :]
    enc1_scale = vecs_ref[1:2, :]
    enc1_zero = vecs_ref[2:3, :]
    norm2_w = vecs_ref[3:4, :]
    proj_b = vecs_ref[4:5, :]
    mlp_proj_b = vecs_ref[5:6, :]
    attn_b = bias2_ref[0:1, :]             # (1, QKV_OUT)
    fc_b = bias2_ref[1:2, :]               # (1, INTERMEDIATE)

    # ---- norm_1 + SimpleParamHeaveside encoder1 ----
    n1 = _rmsnorm(x, norm1_w, NORM_EPS)
    xh = enc1_scale * ((n1 - enc1_zero) > 0).astype(jnp.float32)

    # ---- fused QKV projection: (B*T, C) @ (C, QKV_OUT) ----
    qkv = jnp.dot(xh, attn_w_ref[...],
                  preferred_element_type=jnp.float32) + attn_b

    # ---- stack all query heads / kv groups along sublanes ----
    q_blocks, k_blocks, v_blocks = [], [], []
    for b in range(B):
        qkv_b = qkv[b * T:(b + 1) * T, :]          # (T, QKV_OUT) static slice
        for g in range(N_QUERY_GROUPS):
            base = g * GROUP_W
            for qi in range(Q_PER_KV):
                q_blocks.append(
                    qkv_b[:, base + qi * HEAD_SIZE:base + (qi + 1) * HEAD_SIZE])
            k_blocks.append(
                qkv_b[:, base + Q_PER_KV * HEAD_SIZE:
                      base + (Q_PER_KV + 1) * HEAD_SIZE])
            v_blocks.append(
                qkv_b[:, base + (Q_PER_KV + 1) * HEAD_SIZE:
                      base + (Q_PER_KV + 2) * HEAD_SIZE])
    q_flat = jnp.concatenate(q_blocks, axis=0)     # (NQ_ROWS, hd) = (64, 8)
    k_flat = jnp.concatenate(k_blocks, axis=0)     # (NK_ROWS, hd) = (32, 8)
    v_flat = jnp.concatenate(v_blocks, axis=0)     # (NK_ROWS, hd) = (32, 8)

    # ---- RoPE: 2 applications (q stack, k stack), precomputed full tables ----
    cos_q = rope_ref[0:NQ_ROWS, :]
    sin_q = rope_ref[NQ_ROWS:2 * NQ_ROWS, :]
    cos_k = rope_ref[2 * NQ_ROWS:2 * NQ_ROWS + NK_ROWS, :]
    sin_k = rope_ref[2 * NQ_ROWS + NK_ROWS:2 * NQ_ROWS + 2 * NK_ROWS, :]
    q_rot = q_flat * cos_q + _swap_halves(q_flat) * sin_q
    k_rot = k_flat * cos_k + _swap_halves(k_flat) * sin_k

    # ---- batched scores: one MXU pass for all batches/groups/heads ----
    s = jax.lax.dot_general(q_rot, k_rot, (((1,), (1,)), ((), ())),
                            preferred_element_type=jnp.float32)   # (64, 32)
    # maskscale = 1/sqrt(hd) on (same GQA pair & causal) positions, else 0.
    # QuantReLU(0)=0, so masked / wrong-pair blocks contribute nothing to PV.
    w = _quant_relu(s * maskscale_ref[...], scal_ref[0], scal_ref[1])

    # ---- batched PV: one MXU pass ----
    y_all = jnp.dot(w, v_flat, preferred_element_type=jnp.float32)  # (64, 8)

    # ---- head merge into (B*T, C) scratch slab at static offsets ----
    for b in range(B):
        for g in range(N_QUERY_GROUPS):
            for qi in range(Q_PER_KV):
                h = g * Q_PER_KV + qi
                r0 = ((b * N_QUERY_GROUPS + g) * Q_PER_KV + qi) * T
                y_scr[b * T:(b + 1) * T,
                      h * HEAD_SIZE:(h + 1) * HEAD_SIZE] = y_all[r0:r0 + T, :]
    y = y_scr[...]                                                  # (16, 32)

    # ---- encoder3 + output projection + residual 1 ----
    y = _quant_relu(y, scal_ref[2], scal_ref[3])
    x = x + jnp.dot(y, proj_w_ref[...],
                    preferred_element_type=jnp.float32) + proj_b

    # ---- norm_2 + GptNeoxMLP (quant) + residual 2 ----
    n2 = _rmsnorm(x, norm2_w, NORM_EPS)
    m = _quant_relu(n2, scal_ref[4], scal_ref[5])
    m = jnp.dot(m, fc_w_ref[...],
                preferred_element_type=jnp.float32) + fc_b
    m = _quant_relu(m, scal_ref[6], scal_ref[7])
    m = jnp.dot(m, mlp_proj_w_ref[...],
                preferred_element_type=jnp.float32) + mlp_proj_b

    o_ref[...] = (x + m).astype(o_ref.dtype)


# ------------------------- one-time host-side packing -------------------------
def pack_block_inputs(params, rope_cache):
    """Hoisted out of the per-call path: run once, reuse every forward."""
    cos, sin = rope_cache                                      # (T, hd/2) each
    cos_full = jnp.concatenate([cos, cos], axis=-1)            # (T, hd)
    sin_signed = jnp.concatenate([-sin, sin], axis=-1)         # (T, hd)
    rope = jnp.concatenate([
        jnp.tile(cos_full, (N_STACK_Q, 1)),                    # rows   0: 64
        jnp.tile(sin_signed, (N_STACK_Q, 1)),                  # rows  64:128
        jnp.tile(cos_full, (N_STACK_K, 1)),                    # rows 128:160
        jnp.tile(sin_signed, (N_STACK_K, 1)),                  # rows 160:192
    ], axis=0).astype(jnp.float32)

    # block-diagonal (same GQA pair) AND causal mask, with 1/sqrt(hd) folded in
    r = jnp.arange(NQ_ROWS)[:, None]
    c = jnp.arange(NK_ROWS)[None, :]
    same_pair = (r // (Q_PER_KV * T)) == (c // T)
    causal = (c % T) <= (r % T)
    maskscale = jnp.where(same_pair & causal,
                          1.0 / math.sqrt(HEAD_SIZE), 0.0).astype(jnp.float32)

    vecs = jnp.stack([params["norm1_w"], params["enc1_scale"],
                      params["enc1_zero"], params["norm2_w"],
                      params["proj_b"], params["mlp_proj_b"]], axis=0)   # (6, C)
    bias2 = jnp.stack([params["attn_b"], params["fc_b"]], axis=0)        # (2, 64)

    alphas = jnp.concatenate([params["attn_alpha"], params["enc3_alpha"],
                              params["act1_alpha"], params["act2_alpha"]])
    scal = jnp.stack([1.0 / alphas[0], alphas[0] / LEVELS,
                      1.0 / alphas[1], alphas[1] / LEVELS,
                      1.0 / alphas[2], alphas[2] / LEVELS,
                      1.0 / alphas[3], alphas[3] / LEVELS]).astype(jnp.float32)

    return dict(vecs=vecs, bias2=bias2, rope=rope, maskscale=maskscale,
                scal=scal, attn_w=params["attn_w"], proj_w=params["proj_w"],
                fc_w=params["fc_w"], mlp_proj_w=params["mlp_proj_w"])


# ------------------------------ Block forward --------------------------------
def block_forward(x, packed, kv_cache=None):
    bb, tt, c = x.shape
    x2d = x.reshape(bb * tt, c)                 # lane-dense 2-D slab end-to-end

    vmem = pl.BlockSpec(memory_space=pltpu.MemorySpace.VMEM)
    smem = pl.BlockSpec(memory_space=pltpu.MemorySpace.SMEM)

    out2d = pl.pallas_call(
        _block_kernel,
        in_specs=[vmem] * 9 + [smem],
        out_specs=vmem,
        out_shape=jax.ShapeDtypeStruct((bb * tt, c), x.dtype),
        scratch_shapes=[pltpu.VMEM((bb * tt, c), jnp.float32)],
    )(x2d, packed["vecs"], packed["attn_w"], packed["bias2"],
      packed["proj_w"], packed["fc_w"], packed["mlp_proj_w"],
      packed["rope"], packed["maskscale"], packed["scal"])

    # TODO(synk): kv_cache index_copy / roll path not exercised (kv_cache=None).
    return out2d.reshape(bb, tt, c), kv_cache


# ------------------------------ setup -----------------------------------------
def build_rope_cache(seq_len, n_elem, base=10000.0):
    theta = 1.0 / (base ** (jnp.arange(0, n_elem, 2, dtype=jnp.float32) / n_elem))
    seq = jnp.arange(seq_len, dtype=jnp.float32)
    idx_theta = jnp.outer(seq, theta)                 # (T, n_elem // 2)
    return jnp.cos(idx_theta), jnp.sin(idx_theta)


def init_params(key):
    ks = jax.random.split(key, 8)

    def lin(k, fan_in, fan_out):
        kw, kb = jax.random.split(k)
        w = jax.random.normal(kw, (fan_in, fan_out), jnp.float32) / math.sqrt(fan_in)
        b = 0.01 * jax.random.normal(kb, (fan_out,), jnp.float32)
        return w, b

    attn_w, attn_b = lin(ks[0], N_EMBD, QKV_OUT)
    proj_w, proj_b = lin(ks[1], N_EMBD, N_EMBD)
    fc_w, fc_b = lin(ks[2], N_EMBD, INTERMEDIATE)
    mlp_proj_w, mlp_proj_b = lin(ks[3], INTERMEDIATE, N_EMBD)
    return dict(
        norm1_w=1.0 + 0.1 * jax.random.normal(ks[4], (N_EMBD,), jnp.float32),
        norm2_w=1.0 + 0.1 * jax.random.normal(ks[5], (N_EMBD,), jnp.float32),
        enc1_scale=1.0 + 0.1 * jax.random.normal(ks[6], (N_EMBD,), jnp.float32),
        enc1_zero=0.1 * jax.random.normal(ks[7], (N_EMBD,), jnp.float32),
        attn_alpha=jnp.array([6.0], jnp.float32),   # QuantReLU act_alpha inits
        enc3_alpha=jnp.array([6.0], jnp.float32),
        act1_alpha=jnp.array([6.0], jnp.float32),
        act2_alpha=jnp.array([6.0], jnp.float32),
        attn_w=attn_w, attn_b=attn_b,
        proj_w=proj_w, proj_b=proj_b,
        fc_w=fc_w, fc_b=fc_b,
        mlp_proj_w=mlp_proj_w, mlp_proj_b=mlp_proj_b,
    )


if __name__ == "__main__":
    key = jax.random.PRNGKey(0)
    pkey, xkey = jax.random.split(key)
    params = init_params(pkey)
    x = jax.random.normal(xkey, (B, T, N_EMBD), jnp.float32)
    rope = build_rope_cache(T, HEAD_SIZE)

    packed = pack_block_inputs(params, rope)     # one-time packing (hoisted)
    fwd = jax.jit(block_forward)

    out, new_kv = fwd(x, packed)
    jax.block_until_ready(out)
    assert out.shape == (B, T, N_EMBD) and out.dtype == jnp.float32
    assert bool(jnp.all(jnp.isfinite(out)))
    print("KERNEL_OK")
</pallas_src>

<mosaic_0001>
module attributes {stable_mosaic.version = 11 : i64} {
  func.func @_block_kernel(%arg0: memref<16x32xf32, #tpu.memory_space<vmem>>, %arg1: memref<6x32xf32, #tpu.memory_space<vmem>>, %arg2: memref<32x64xf32, #tpu.memory_space<vmem>>, %arg3: memref<2x64xf32, #tpu.memory_space<vmem>>, %arg4: memref<32x32xf32, #tpu.memory_space<vmem>>, %arg5: memref<32x64xf32, #tpu.memory_space<vmem>>, %arg6: memref<64x32xf32, #tpu.memory_space<vmem>>, %arg7: memref<192x8xf32, #tpu.memory_space<vmem>>, %arg8: memref<64x32xf32, #tpu.memory_space<vmem>>, %arg9: memref<8xf32, #tpu.memory_space<smem>>, %arg10: memref<16x32xf32, #tpu.memory_space<vmem>>, %arg11: memref<16x32xf32, #tpu.memory_space<vmem>>) attributes {dimension_semantics = [], scalar_prefetch = 0 : i64, scratch_operands = 1 : i64, tpu.core_type = #tpu.core_type<tc>} {
    %c0 = arith.constant 0 : index
    %c0_0 = arith.constant 0 : index
    %0 = vector.load %arg0[%c0, %c0_0] : memref<16x32xf32, #tpu.memory_space<vmem>>, vector<16x32xf32>
    %c0_1 = arith.constant 0 : index
    %c0_2 = arith.constant 0 : index
    %1 = vector.load %arg1[%c0_1, %c0_2] : memref<6x32xf32, #tpu.memory_space<vmem>>, vector<1x32xf32>
    %c1 = arith.constant 1 : index
    %c0_3 = arith.constant 0 : index
    %2 = vector.load %arg1[%c1, %c0_3] : memref<6x32xf32, #tpu.memory_space<vmem>>, vector<1x32xf32>
    %c2 = arith.constant 2 : index
    %c0_4 = arith.constant 0 : index
    %3 = vector.load %arg1[%c2, %c0_4] : memref<6x32xf32, #tpu.memory_space<vmem>>, vector<1x32xf32>
    %c3 = arith.constant 3 : index
    %c0_5 = arith.constant 0 : index
    %4 = vector.load %arg1[%c3, %c0_5] : memref<6x32xf32, #tpu.memory_space<vmem>>, vector<1x32xf32>
    %c4 = arith.constant 4 : index
    %c0_6 = arith.constant 0 : index
    %5 = vector.load %arg1[%c4, %c0_6] : memref<6x32xf32, #tpu.memory_space<vmem>>, vector<1x32xf32>
    %c5 = arith.constant 5 : index
    %c0_7 = arith.constant 0 : index
    %6 = vector.load %arg1[%c5, %c0_7] : memref<6x32xf32, #tpu.memory_space<vmem>>, vector<1x32xf32>
    %c0_8 = arith.constant 0 : index
    %c0_9 = arith.constant 0 : index
    %7 = vector.load %arg3[%c0_8, %c0_9] : memref<2x64xf32, #tpu.memory_space<vmem>>, vector<1x64xf32>
    %c1_10 = arith.constant 1 : index
    %c0_11 = arith.constant 0 : index
    %8 = vector.load %arg3[%c1_10, %c0_11] : memref<2x64xf32, #tpu.memory_space<vmem>>, vector<1x64xf32>
    %9 = arith.mulf %0, %0 : vector<16x32xf32>
    %cst = arith.constant dense<0.000000e+00> : vector<16xf32>
    %10 = vector.multi_reduction <add>, %9, %cst [1] : vector<16x32xf32> to vector<16xf32>
    %11 = vector.shape_cast %10 : vector<16xf32> to vector<16x1xf32>
    %cst_12 = arith.constant 3.200000e+01 : f32
    %12 = vector.broadcast %cst_12 : f32 to vector<16x1xf32>
    %13 = arith.divf %11, %12 : vector<16x1xf32>
    %cst_13 = arith.constant 9.99999974E-6 : f32
    %14 = vector.broadcast %cst_13 : f32 to vector<16x1xf32>
    %15 = arith.addf %13, %14 : vector<16x1xf32>
    %16 = math.rsqrt %15 : vector<16x1xf32>
    %17 = vector.broadcast %16 : vector<16x1xf32> to vector<16x32xf32>
    %18 = arith.mulf %0, %17 : vector<16x32xf32>
    %19 = vector.broadcast %1 : vector<1x32xf32> to vector<16x32xf32>
    %20 = arith.mulf %19, %18 : vector<16x32xf32>
    %21 = vector.broadcast %3 : vector<1x32xf32> to vector<16x32xf32>
    %22 = arith.subf %20, %21 : vector<16x32xf32>
    %cst_14 = arith.constant 0.000000e+00 : f32
    %23 = vector.broadcast %cst_14 : f32 to vector<16x32xf32>
    %24 = arith.cmpf ogt, %22, %23 : vector<16x32xf32>
    %25 = arith.extui %24 : vector<16x32xi1> to vector<16x32xi32>
    %26 = arith.sitofp %25 : vector<16x32xi32> to vector<16x32xf32>
    %27 = vector.broadcast %2 : vector<1x32xf32> to vector<16x32xf32>
    %28 = arith.mulf %27, %26 : vector<16x32xf32>
    %c0_15 = arith.constant 0 : index
    %c0_16 = arith.constant 0 : index
    %29 = vector.load %arg2[%c0_15, %c0_16] : memref<32x64xf32, #tpu.memory_space<vmem>>, vector<32x64xf32>
    %cst_17 = arith.constant dense<0.000000e+00> : vector<16x64xf32>
    %30 = tpu.matmul %28, %29, %cst_17 {dimension_numbers = #tpu.dot_dimension_numbers<[1], [0], [0], [1], [0, 0, 1, 1], [], []>} : vector<16x32xf32>, vector<32x64xf32>, vector<16x64xf32> -> vector<16x64xf32>
    %31 = vector.broadcast %7 : vector<1x64xf32> to vector<16x64xf32>
    %32 = arith.addf %30, %31 : vector<16x64xf32>
    %33 = vector.extract_strided_slice %32 {offsets = [0, 0], sizes = [8, 64], strides = [1, 1]} : vector<16x64xf32> to vector<8x64xf32>
    %34 = vector.extract_strided_slice %33 {offsets = [0, 0], sizes = [8, 8], strides = [1, 1]} : vector<8x64xf32> to vector<8x8xf32>
    %35 = vector.extract_strided_slice %33 {offsets = [0, 8], sizes = [8, 8], strides = [1, 1]} : vector<8x64xf32> to vector<8x8xf32>
    %36 = vector.extract_strided_slice %33 {offsets = [0, 16], sizes = [8, 8], strides = [1, 1]} : vector<8x64xf32> to vector<8x8xf32>
    %37 = vector.extract_strided_slice %33 {offsets = [0, 24], sizes = [8, 8], strides = [1, 1]} : vector<8x64xf32> to vector<8x8xf32>
    %38 = vector.extract_strided_slice %33 {offsets = [0, 32], sizes = [8, 8], strides = [1, 1]} : vector<8x64xf32> to vector<8x8xf32>
    %39 = vector.extract_strided_slice %33 {offsets = [0, 40], sizes = [8, 8], strides = [1, 1]} : vector<8x64xf32> to vector<8x8xf32>
    %40 = vector.extract_strided_slice %33 {offsets = [0, 48], sizes = [8, 8], strides = [1, 1]} : vector<8x64xf32> to vector<8x8xf32>
    %41 = vector.extract_strided_slice %33 {offsets = [0, 56], sizes = [8, 8], strides = [1, 1]} : vector<8x64xf32> to vector<8x8xf32>
    %42 = vector.extract_strided_slice %32 {offsets = [8, 0], sizes = [8, 64], strides = [1, 1]} : vector<16x64xf32> to vector<8x64xf32>
    %43 = vector.extract_strided_slice %42 {offsets = [0, 0], sizes = [8, 8], strides = [1, 1]} : vector<8x64xf32> to vector<8x8xf32>
    %44 = vector.extract_strided_slice %42 {offsets = [0, 8], sizes = [8, 8], strides = [1, 1]} : vector<8x64xf32> to vector<8x8xf32>
    %45 = vector.extract_strided_slice %42 {offsets = [0, 16], sizes = [8, 8], strides = [1, 1]} : vector<8x64xf32> to vector<8x8xf32>
    %46 = vector.extract_strided_slice %42 {offsets = [0, 24], sizes = [8, 8], strides = [1, 1]} : vector<8x64xf32> to vector<8x8xf32>
    %47 = vector.extract_strided_slice %42 {offsets = [0, 32], sizes = [8, 8], strides = [1, 1]} : vector<8x64xf32> to vector<8x8xf32>
    %48 = vector.extract_strided_slice %42 {offsets = [0, 40], sizes = [8, 8], strides = [1, 1]} : vector<8x64xf32> to vector<8x8xf32>
    %49 = vector.extract_strided_slice %42 {offsets = [0, 48], sizes = [8, 8], strides = [1, 1]} : vector<8x64xf32> to vector<8x8xf32>
    %50 = vector.extract_strided_slice %42 {offsets = [0, 56], sizes = [8, 8], strides = [1, 1]} : vector<8x64xf32> to vector<8x8xf32>
    %51 = tpu.concatenate %34, %35, %38, %39, %43, %44, %47, %48 in 0 : vector<8x8xf32>, vector<8x8xf32>, vector<8x8xf32>, vector<8x8xf32>, vector<8x8xf32>, vector<8x8xf32>, vector<8x8xf32>, vector<8x8xf32> -> vector<64x8xf32>
    %52 = tpu.concatenate %36, %40, %45, %49 in 0 : vector<8x8xf32>, vector<8x8xf32>, vector<8x8xf32>, vector<8x8xf32> -> vector<32x8xf32>
    %53 = tpu.concatenate %37, %41, %46, %50 in 0 : vector<8x8xf32>, vector<8x8xf32>, vector<8x8xf32>, vector<8x8xf32> -> vector<32x8xf32>
    %c0_18 = arith.constant 0 : index
    %c0_19 = arith.constant 0 : index
    %54 = vector.load %arg7[%c0_18, %c0_19] : memref<192x8xf32, #tpu.memory_space<vmem>>, vector<64x8xf32>
    %c64 = arith.constant 64 : index
    %c0_20 = arith.constant 0 : index
    %55 = vector.load %arg7[%c64, %c0_20] : memref<192x8xf32, #tpu.memory_space<vmem>>, vector<64x8xf32>
    %c128 = arith.constant 128 : index
    %c0_21 = arith.constant 0 : index
    %56 = vector.load %arg7[%c128, %c0_21] : memref<192x8xf32, #tpu.memory_space<vmem>>, vector<32x8xf32>
    %c160 = arith.constant 160 : index
    %c0_22 = arith.constant 0 : index
    %57 = vector.load %arg7[%c160, %c0_22] : memref<192x8xf32, #tpu.memory_space<vmem>>, vector<32x8xf32>
    %58 = arith.mulf %51, %54 : vector<64x8xf32>
    %59 = vector.extract_strided_slice %51 {offsets = [0, 4], sizes = [64, 4], strides = [1, 1]} : vector<64x8xf32> to vector<64x4xf32>
    %60 = vector.extract_strided_slice %51 {offsets = [0, 0], sizes = [64, 4], strides = [1, 1]} : vector<64x8xf32> to vector<64x4xf32>
    %61 = tpu.concatenate %59, %60 in 1 : vector<64x4xf32>, vector<64x4xf32> -> vector<64x8xf32>
    %62 = arith.mulf %61, %55 : vector<64x8xf32>
    %63 = arith.addf %58, %62 : vector<64x8xf32>
    %64 = arith.mulf %52, %56 : vector<32x8xf32>
    %65 = vector.extract_strided_slice %52 {offsets = [0, 4], sizes = [32, 4], strides = [1, 1]} : vector<32x8xf32> to vector<32x4xf32>
    %66 = vector.extract_strided_slice %52 {offsets = [0, 0], sizes = [32, 4], strides = [1, 1]} : vector<32x8xf32> to vector<32x4xf32>
    %67 = tpu.concatenate %65, %66 in 1 : vector<32x4xf32>, vector<32x4xf32> -> vector<32x8xf32>
    %68 = arith.mulf %67, %57 : vector<32x8xf32>
    %69 = arith.addf %64, %68 : vector<32x8xf32>
    %cst_23 = arith.constant dense<0.000000e+00> : vector<64x32xf32>
    %70 = tpu.matmul %63, %69, %cst_23 {dimension_numbers = #tpu.dot_dimension_numbers<[1], [1], [0], [0], [0, 0, 1, 0], [], []>} : vector<64x8xf32>, vector<32x8xf32>, vector<64x32xf32> -> vector<64x32xf32>
    %c0_24 = arith.constant 0 : index
    %c0_25 = arith.constant 0 : index
    %71 = vector.load %arg8[%c0_24, %c0_25] : memref<64x32xf32, #tpu.memory_space<vmem>>, vector<64x32xf32>
    %72 = arith.mulf %70, %71 : vector<64x32xf32>
    %c0_26 = arith.constant 0 : index
    %73 = memref.load %arg9[%c0_26] : memref<8xf32, #tpu.memory_space<smem>>
    %c1_27 = arith.constant 1 : index
    %74 = memref.load %arg9[%c1_27] : memref<8xf32, #tpu.memory_space<smem>>
    %cst_28 = arith.constant 0.000000e+00 : f32
    %75 = vector.broadcast %cst_28 : f32 to vector<64x32xf32>
    %76 = arith.maximumf %72, %75 : vector<64x32xf32>
    %77 = vector.broadcast %73 : f32 to vector<64x32xf32>
    %78 = arith.mulf %76, %77 : vector<64x32xf32>
    %cst_29 = arith.constant 0.000000e+00 : f32
    %cst_30 = arith.constant 1.000000e+00 : f32
    %79 = vector.broadcast %cst_29 : f32 to vector<64x32xf32>
    %80 = arith.maximumf %79, %78 : vector<64x32xf32>
    %81 = vector.broadcast %cst_30 : f32 to vector<64x32xf32>
    %82 = arith.minimumf %81, %80 : vector<64x32xf32>
    %cst_31 = arith.constant 1.500000e+01 : f32
    %83 = vector.broadcast %cst_31 : f32 to vector<64x32xf32>
    %84 = arith.mulf %82, %83 : vector<64x32xf32>
    %85 = math.roundeven %84 : vector<64x32xf32>
    %86 = vector.broadcast %74 : f32 to vector<64x32xf32>
    %87 = arith.mulf %85, %86 : vector<64x32xf32>
    %cst_32 = arith.constant dense<0.000000e+00> : vector<64x8xf32>
    %88 = tpu.matmul %87, %53, %cst_32 {dimension_numbers = #tpu.dot_dimension_numbers<[1], [0], [0], [1], [0, 0, 1, 1], [], []>} : vector<64x32xf32>, vector<32x8xf32>, vector<64x8xf32> -> vector<64x8xf32>
    %89 = vector.extract_strided_slice %88 {offsets = [0, 0], sizes = [8, 8], strides = [1, 1]} : vector<64x8xf32> to vector<8x8xf32>
    %c0_33 = arith.constant 0 : index
    %c0_34 = arith.constant 0 : index
    %90 = vector.load %arg11[%c0_33, %c0_34] : memref<16x32xf32, #tpu.memory_space<vmem>>, vector<8x8xf32>
    tpu.vector_store %arg11[%c0_33, %c0_34], %89 {strides = array<i32>} : memref<16x32xf32, #tpu.memory_space<vmem>>, vector<8x8xf32>,
    %91 = vector.extract_strided_slice %88 {offsets = [8, 0], sizes = [8, 8], strides = [1, 1]} : vector<64x8xf32> to vector<8x8xf32>
    %c0_35 = arith.constant 0 : index
    %c8 = arith.constant 8 : index
    %92 = vector.load %arg11[%c0_35, %c8] : memref<16x32xf32, #tpu.memory_space<vmem>>, vector<8x8xf32>
    tpu.vector_store %arg11[%c0_35, %c8], %91 {strides = array<i32>} : memref<16x32xf32, #tpu.memory_space<vmem>>, vector<8x8xf32>,
    %93 = vector.extract_strided_slice %88 {offsets = [16, 0], sizes = [8, 8], strides = [1, 1]} : vector<64x8xf32> to vector<8x8xf32>
    %c0_36 = arith.constant 0 : index
    %c16 = arith.constant 16 : index
    %94 = vector.load %arg11[%c0_36, %c16] : memref<16x32xf32, #tpu.memory_space<vmem>>, vector<8x8xf32>
    tpu.vector_store %arg11[%c0_36, %c16], %93 {strides = array<i32>} : memref<16x32xf32, #tpu.memory_space<vmem>>, vector<8x8xf32>,
    %95 = vector.extract_strided_slice %88 {offsets = [24, 0], sizes = [8, 8], strides = [1, 1]} : vector<64x8xf32> to vector<8x8xf32>
    %c0_37 = arith.constant 0 : index
    %c24 = arith.constant 24 : index
    %96 = vector.load %arg11[%c0_37, %c24] : memref<16x32xf32, #tpu.memory_space<vmem>>, vector<8x8xf32>
    tpu.vector_store %arg11[%c0_37, %c24], %95 {strides = array<i32>} : memref<16x32xf32, #tpu.memory_space<vmem>>, vector<8x8xf32>,
    %97 = vector.extract_strided_slice %88 {offsets = [32, 0], sizes = [8, 8], strides = [1, 1]} : vector<64x8xf32> to vector<8x8xf32>
    %c8_38 = arith.constant 8 : index
    %c0_39 = arith.constant 0 : index
    %98 = vector.load %arg11[%c8_38, %c0_39] : memref<16x32xf32, #tpu.memory_space<vmem>>, vector<8x8xf32>
    tpu.vector_store %arg11[%c8_38, %c0_39], %97 {strides = array<i32>} : memref<16x32xf32, #tpu.memory_space<vmem>>, vector<8x8xf32>,
    %99 = vector.extract_strided_slice %88 {offsets = [40, 0], sizes = [8, 8], strides = [1, 1]} : vector<64x8xf32> to vector<8x8xf32>
    %c8_40 = arith.constant 8 : index
    %c8_41 = arith.constant 8 : index
    %100 = vector.load %arg11[%c8_40, %c8_41] : memref<16x32xf32, #tpu.memory_space<vmem>>, vector<8x8xf32>
    tpu.vector_store %arg11[%c8_40, %c8_41], %99 {strides = array<i32>} : memref<16x32xf32, #tpu.memory_space<vmem>>, vector<8x8xf32>,
    %101 = vector.extract_strided_slice %88 {offsets = [48, 0], sizes = [8, 8], strides = [1, 1]} : vector<64x8xf32> to vector<8x8xf32>
    %c8_42 = arith.constant 8 : index
    %c16_43 = arith.constant 16 : index
    %102 = vector.load %arg11[%c8_42, %c16_43] : memref<16x32xf32, #tpu.memory_space<vmem>>, vector<8x8xf32>
    tpu.vector_store %arg11[%c8_42, %c16_43], %101 {strides = array<i32>} : memref<16x32xf32, #tpu.memory_space<vmem>>, vector<8x8xf32>,
    %103 = vector.extract_strided_slice %88 {offsets = [56, 0], sizes = [8, 8], strides = [1, 1]} : vector<64x8xf32> to vector<8x8xf32>
    %c8_44 = arith.constant 8 : index
    %c24_45 = arith.constant 24 : index
    %104 = vector.load %arg11[%c8_44, %c24_45] : memref<16x32xf32, #tpu.memory_space<vmem>>, vector<8x8xf32>
    tpu.vector_store %arg11[%c8_44, %c24_45], %103 {strides = array<i32>} : memref<16x32xf32, #tpu.memory_space<vmem>>, vector<8x8xf32>,
    %c0_46 = arith.constant 0 : index
    %c0_47 = arith.constant 0 : index
    %105 = vector.load %arg11[%c0_46, %c0_47] : memref<16x32xf32, #tpu.memory_space<vmem>>, vector<16x32xf32>
    %c2_48 = arith.constant 2 : index
    %106 = memref.load %arg9[%c2_48] : memref<8xf32, #tpu.memory_space<smem>>
    %c3_49 = arith.constant 3 : index
    %107 = memref.load %arg9[%c3_49] : memref<8xf32, #tpu.memory_space<smem>>
    %cst_50 = arith.constant 0.000000e+00 : f32
    %108 = vector.broadcast %cst_50 : f32 to vector<16x32xf32>
    %109 = arith.maximumf %105, %108 : vector<16x32xf32>
    %110 = vector.broadcast %106 : f32 to vector<16x32xf32>
    %111 = arith.mulf %109, %110 : vector<16x32xf32>
    %cst_51 = arith.constant 0.000000e+00 : f32
    %cst_52 = arith.constant 1.000000e+00 : f32
    %112 = vector.broadcast %cst_51 : f32 to vector<16x32xf32>
    %113 = arith.maximumf %112, %111 : vector<16x32xf32>
    %114 = vector.broadcast %cst_52 : f32 to vector<16x32xf32>
    %115 = arith.minimumf %114, %113 : vector<16x32xf32>
    %cst_53 = arith.constant 1.500000e+01 : f32
    %116 = vector.broadcast %cst_53 : f32 to vector<16x32xf32>
    %117 = arith.mulf %115, %116 : vector<16x32xf32>
    %118 = math.roundeven %117 : vector<16x32xf32>
    %119 = vector.broadcast %107 : f32 to vector<16x32xf32>
    %120 = arith.mulf %118, %119 : vector<16x32xf32>
    %c0_54 = arith.constant 0 : index
    %c0_55 = arith.constant 0 : index
    %121 = vector.load %arg4[%c0_54, %c0_55] : memref<32x32xf32, #tpu.memory_space<vmem>>, vector<32x32xf32>
    %cst_56 = arith.constant dense<0.000000e+00> : vector<16x32xf32>
    %122 = tpu.matmul %120, %121, %cst_56 {dimension_numbers = #tpu.dot_dimension_numbers<[1], [0], [0], [1], [0, 0, 1, 1], [], []>} : vector<16x32xf32>, vector<32x32xf32>, vector<16x32xf32> -> vector<16x32xf32>
    %123 = arith.addf %0, %122 : vector<16x32xf32>
    %124 = vector.broadcast %5 : vector<1x32xf32> to vector<16x32xf32>
    %125 = arith.addf %123, %124 : vector<16x32xf32>
    %126 = arith.mulf %125, %125 : vector<16x32xf32>
    %cst_57 = arith.constant dense<0.000000e+00> : vector<16xf32>
    %127 = vector.multi_reduction <add>, %126, %cst_57 [1] : vector<16x32xf32> to vector<16xf32>
    %128 = vector.shape_cast %127 : vector<16xf32> to vector<16x1xf32>
    %cst_58 = arith.constant 3.200000e+01 : f32
    %129 = vector.broadcast %cst_58 : f32 to vector<16x1xf32>
    %130 = arith.divf %128, %129 : vector<16x1xf32>
    %cst_59 = arith.constant 9.99999974E-6 : f32
    %131 = vector.broadcast %cst_59 : f32 to vector<16x1xf32>
    %132 = arith.addf %130, %131 : vector<16x1xf32>
    %133 = math.rsqrt %132 : vector<16x1xf32>
    %134 = vector.broadcast %133 : vector<16x1xf32> to vector<16x32xf32>
    %135 = arith.mulf %125, %134 : vector<16x32xf32>
    %136 = vector.broadcast %4 : vector<1x32xf32> to vector<16x32xf32>
    %137 = arith.mulf %136, %135 : vector<16x32xf32>
    %c4_60 = arith.constant 4 : index
    %138 = memref.load %arg9[%c4_60] : memref<8xf32, #tpu.memory_space<smem>>
    %c5_61 = arith.constant 5 : index
    %139 = memref.load %arg9[%c5_61] : memref<8xf32, #tpu.memory_space<smem>>
    %cst_62 = arith.constant 0.000000e+00 : f32
    %140 = vector.broadcast %cst_62 : f32 to vector<16x32xf32>
    %141 = arith.maximumf %137, %140 : vector<16x32xf32>
    %142 = vector.broadcast %138 : f32 to vector<16x32xf32>
    %143 = arith.mulf %141, %142 : vector<16x32xf32>
    %cst_63 = arith.constant 0.000000e+00 : f32
    %cst_64 = arith.constant 1.000000e+00 : f32
    %144 = vector.broadcast %cst_63 : f32 to vector<16x32xf32>
    %145 = arith.maximumf %144, %143 : vector<16x32xf32>
    %146 = vector.broadcast %cst_64 : f32 to vector<16x32xf32>
    %147 = arith.minimumf %146, %145 : vector<16x32xf32>
    %cst_65 = arith.constant 1.500000e+01 : f32
    %148 = vector.broadcast %cst_65 : f32 to vector<16x32xf32>
    %149 = arith.mulf %147, %148 : vector<16x32xf32>
    %150 = math.roundeven %149 : vector<16x32xf32>
    %151 = vector.broadcast %139 : f32 to vector<16x32xf32>
    %152 = arith.mulf %150, %151 : vector<16x32xf32>
    %c0_66 = arith.constant 0 : index
    %c0_67 = arith.constant 0 : index
    %153 = vector.load %arg5[%c0_66, %c0_67] : memref<32x64xf32, #tpu.memory_space<vmem>>, vector<32x64xf32>
    %cst_68 = arith.constant dense<0.000000e+00> : vector<16x64xf32>
    %154 = tpu.matmul %152, %153, %cst_68 {dimension_numbers = #tpu.dot_dimension_numbers<[1], [0], [0], [1], [0, 0, 1, 1], [], []>} : vector<16x32xf32>, vector<32x64xf32>, vector<16x64xf32> -> vector<16x64xf32>
    %155 = vector.broadcast %8 : vector<1x64xf32> to vector<16x64xf32>
    %156 = arith.addf %154, %155 : vector<16x64xf32>
    %c6 = arith.constant 6 : index
    %157 = memref.load %arg9[%c6] : memref<8xf32, #tpu.memory_space<smem>>
    %c7 = arith.constant 7 : index
    %158 = memref.load %arg9[%c7] : memref<8xf32, #tpu.memory_space<smem>>
    %cst_69 = arith.constant 0.000000e+00 : f32
    %159 = vector.broadcast %cst_69 : f32 to vector<16x64xf32>
    %160 = arith.maximumf %156, %159 : vector<16x64xf32>
    %161 = vector.broadcast %157 : f32 to vector<16x64xf32>
    %162 = arith.mulf %160, %161 : vector<16x64xf32>
    %cst_70 = arith.constant 0.000000e+00 : f32
    %cst_71 = arith.constant 1.000000e+00 : f32
    %163 = vector.broadcast %cst_70 : f32 to vector<16x64xf32>
    %164 = arith.maximumf %163, %162 : vector<16x64xf32>
    %165 = vector.broadcast %cst_71 : f32 to vector<16x64xf32>
    %166 = arith.minimumf %165, %164 : vector<16x64xf32>
    %cst_72 = arith.constant 1.500000e+01 : f32
    %167 = vector.broadcast %cst_72 : f32 to vector<16x64xf32>
    %168 = arith.mulf %166, %167 : vector<16x64xf32>
    %169 = math.roundeven %168 : vector<16x64xf32>
    %170 = vector.broadcast %158 : f32 to vector<16x64xf32>
    %171 = arith.mulf %169, %170 : vector<16x64xf32>
    %c0_73 = arith.constant 0 : index
    %c0_74 = arith.constant 0 : index
    %172 = vector.load %arg6[%c0_73, %c0_74] : memref<64x32xf32, #tpu.memory_space<vmem>>, vector<64x32xf32>
    %cst_75 = arith.constant dense<0.000000e+00> : vector<16x32xf32>
    %173 = tpu.matmul %171, %172, %cst_75 {dimension_numbers = #tpu.dot_dimension_numbers<[1], [0], [0], [1], [0, 0, 1, 1], [], []>} : vector<16x64xf32>, vector<64x32xf32>, vector<16x32xf32> -> vector<16x32xf32>
    %174 = vector.broadcast %6 : vector<1x32xf32> to vector<16x32xf32>
    %175 = arith.addf %173, %174 : vector<16x32xf32>
    %176 = arith.addf %125, %175 : vector<16x32xf32>
    %c0_76 = arith.constant 0 : index
    %c0_77 = arith.constant 0 : index
    %177 = vector.load %arg10[%c0_76, %c0_77] : memref<16x32xf32, #tpu.memory_space<vmem>>, vector<16x32xf32>
    tpu.vector_store %arg10[%c0_76, %c0_77], %176 {strides = array<i32>} : memref<16x32xf32, #tpu.memory_space<vmem>>, vector<16x32xf32>,
    return
  }
}

</mosaic_0001>

<bundles_post_ra>
// kernel: block_forward.1
= control target key start
LH: loop header
LB: loop body
LE: loop exit
PB: predicated region body
PF: predicated region fallthrough
CT: control target
= control target key end

     0   :  { %15 = vsyncpa [#allocation5], 0  ;;  %s2021_s0 = inlined_call_operand.vmem [shape: f32[16,32], index: 0, kind: input, shape index: {}]   ;;  %s2022_s1 = inlined_call_operand.vmem [shape: f32[6,32], index: 1, kind: input, shape index: {}]   ;;  %s2023_s2 = inlined_call_operand.vmem [shape: f32[32,64], index: 2, kind: input, shape index: {}]   ;;  %s2024_s3 = inlined_call_operand.vmem [shape: f32[2,64], index: 3, kind: input, shape index: {}]   ;;  %s2025_s4 = inlined_call_operand.vmem [shape: f32[32,32], index: 4, kind: input, shape index: {}]   ;;  %s2026_s5 = inlined_call_operand.vmem [shape: f32[32,64], index: 5, kind: input, shape index: {}]   ;;  %s2027_s6 = inlined_call_operand.vmem [shape: f32[64,32], index: 6, kind: input, shape index: {}]   ;;  %s2028_s7 = inlined_call_operand.vmem [shape: f32[192,8], index: 7, kind: input, shape index: {}]   ;;  %s2029_s8 = inlined_call_operand.vmem [shape: f32[64,32], index: 8, kind: input, shape index: {}]   ;;  %s2030_s9 = inlined_call_operand.vmem [shape: f32[8], index: 9, kind: input, shape index: {}]   ;;  %s2031_s10 = inlined_call_operand.hbm [shape: f32[16,32], index: 10, kind: output, shape index: {}]  }
   0x1   :  { %16 = vsyncpa [#allocation4], 0  ;;  %s41_s15 = sshll.u32 %s2030_s9, 4  ;;  %s42_s15 = int_to_ptr.vmem [resolvable:$true] %s41_s15 }
   0x2   :  { %s1489_s16 = scalar_lea.vmem %s42_s15, 16  ;;  %p1494_p1 = scmp.lt.s32.totalorder %s42_s15, %s42_s15 }
   0x3   :  { %p1490_p0 = scmp.ne.s32.totalorder %s42_s15, %s1489_s16  ;;  %p1495_p2 = scmp.lt.s32.totalorder %s1489_s16, %s1489_s16 }
   0x5   :  { %p1496_p3 = por %p1495_p2, %p1494_p1 }
   0x7   :  { %p1497_p4 = pnand %p1496_p3, %p1490_p0 }
   0x9   :  { %1500 = shalt.err (!%p1497_p4)
}
   0xa   :  { %s1525_s17 = smov [#allocation3]  }
   0xb   :  { %44 = dma.vmem_to_smem %s42_s15, 16, %s1525_s17, [#allocation5]  }
   0xc   :  { %1521 = dma.done.wait [#allocation5], 16  }
   0xd   :  { %1522 = vsyncadd [#allocation5], 4294967280 }
   0xe   :  { %48 = sfence }
   0xf   :  { %v1602_v0 = vld [vmem:[%s2021_s0] sm:$0xff]  ;;  %vm61_vm0 = vcmask 261120   ;;  %v1607_v1 = vld [vmem:[%s2021_s0 + $0x8] sm:$0xff]  ;;  %v104_v6 = vld [vmem:[%s2023_s2 + $0x18] sm:$0xff]  ;;  %v1526_v26 = vmov 0.0   ;;  %s1527_s15 = smov 96  }
  0x10   :  { %v59_v2 = vmul.f32 %v1602_v0, %v1602_v0  ;;  %v60_v3 = vmul.f32 %v1607_v1, %v1607_v1  ;;  %v103_v7 = vld [vmem:[%s2023_s2 + $0x10] sm:$0xff]  ;;  %1261 = vmatprep.subr.mxu1 %v104_v6  ;;  %v102_v8 = vld [vmem:[%s2023_s2 + $0x8] sm:$0xff]  ;;  %v101_v9 = vld [vmem:[%s2023_s2] sm:$0xff]  ;;  %s1528_s16 = smov 108   ;;  %s1529_s17 = smov 116   ;;  %vm290_vm3 = vcmask 31744  }
  0x11   :  { %1262 = vmatpush3.msra.mxu1 %v104_v6  ;;  %v1164_v17 = vld [vmem:[%s2022_s1] ss:$0 sm:$0xff]  ;;  %v1165_v19 = vld [vmem:[%s2022_s1 + $0x2] ss:$0 sm:$0xff]  ;;  %v1168_v24 = vld [vmem:[%s2022_s1 + $0x1] ss:$0 sm:$0xff] }
  0x12   :  { %v62_v4 = vsel %vm61_vm0, %v59_v2, 0.0  ;;  %v65_v5 = vsel %vm61_vm0, %v60_v3, 0.0  ;;  %1263 = vmatprep.subr.mxu1 %v103_v7  ;;  %v1169_v32 = vld [vmem:[%s2024_s3] ss:$0 sm:$0xff]  ;;  %v229_v39 = vld [vmem:[%s2028_s7 + $0x98] sm:$0xff]  ;;  %s1530_s9 = smov 16  }
  0x13   :  { %63 = vadd.xlane.f32.xlu0 %v62_v4  ;;  %1264 = vmatpush3.msra.mxu1 %v103_v7  ;;  %v228_v40 = vld [vmem:[%s2028_s7 + $0x90] sm:$0xff]  ;;  %v227_v41 = vld [vmem:[%s2028_s7 + $0x88] sm:$0xff]  ;;  %v226_v42 = vld [vmem:[%s2028_s7 + $0x80] sm:$0xff]  ;;  %s1531_s25 = smov 120   ;;  %s1532_s26 = smov 4   ;;  %vm399_vm4 = vcmask 64512  }
  0x14   :  { %1265 = vmatprep.subr.mxu1 %v102_v8  ;;  %v233_v45 = vld [vmem:[%s2028_s7 + $0xb8] sm:$0xff]  ;;  %v232_v50 = vld [vmem:[%s2028_s7 + $0xb0] sm:$0xff]  ;;  %v231_v54 = vld [vmem:[%s2028_s7 + $0xa8] sm:$0xff]  ;;  %s1533_s14 = smov 88   ;;  %s1536_s21 = smov 104   ;;  %vm759_vm13 = vcmask 130112  }
  0x15   :  { %1266 = vmatpush3.msra.mxu1 %v102_v8  ;;  %v230_v58 = vld [vmem:[%s2028_s7 + $0xa0] sm:$0xff]  ;;  %vm765_vm14 = vcmask 195712   ;;  %vm771_vm15 = vcmask 261312   ;;  %s1193_s30 = sld [smem:[#allocation3 + $0x2]] }
  0x16   :  { %1267 = vmatprep.subr.mxu1 %v101_v9  ;;  %s1199_s19 = sld [smem:[#allocation3 + $0x4]] }
  0x17   :  { %66 = vadd.xlane.f32.xlu0 %v65_v5  ;;  %1268 = vmatpush3.msra.mxu1 %v101_v9  ;;  %s1204_s13 = sld [smem:[#allocation3 + $0x6]] }
  0x9c   :  { %v64_v10 = vpop.xlane.xlu0 %63 }
  0x9d   :  { %v69_v11 = vmul.f32 0.03125, %v64_v10 }
  0x9f   :  { %v71_v12 = vadd.f32 1e-05, %v69_v11 }
  0xa0   :  { %v67_v13 = vpop.xlane.xlu0 %66 }
  0xa1   :  { %1481 = vrsqrt.f32 %v71_v12  ;;  %v70_v14 = vmul.f32 0.03125, %v67_v13 }
  0xa3   :  { %v72_v15 = vadd.f32 1e-05, %v70_v14 }
  0xa5   :  { %1483 = vrsqrt.f32 %v72_v15 }
  0xae   :  { %v1482_v16 = vpop.eup %1481 }
  0xaf   :  { %v75_v18 = vmul.f32 %v1482_v16, %v1602_v0 }
  0xb1   :  { %v81_v20 = vmul.f32 %v1164_v17, %v75_v18 }
  0xb2   :  { %v1484_v21 = vpop.eup %1483 }
  0xb3   :  { %v76_v22 = vmul.f32 %v1484_v21, %v1607_v1  ;;  %v87_v23 = vsub.f32 %v81_v20, %v1165_v19  ;;  %v210_v21 = vld [vmem:[%s2028_s7] sm:$0xff] }
  0xb5   :  { %v82_v25 = vmul.f32 %v1164_v17, %v76_v22  ;;  %vm89_vm1 = vcmp.gt.f32.partialorder %v87_v23, 0.0  ;;  %v218_v22 = vld [vmem:[%s2028_s7 + $0x40] sm:$0xff] }
  0xb6   :  { %v1166_v27 = vsel %vm89_vm1, 1.0, %v1526_v26 }
  0xb7   :  { %v88_v28 = vsub.f32 %v82_v25, %v1165_v19  ;;  %v99_v29 = vmul.f32 %v1168_v24, %v1166_v27 }
  0xb9   :  { %vm90_vm2 = vcmp.gt.f32.partialorder %v88_v28, 0.0  ;;  %1269 = vmatprep.mubr.msk.f32.mxu1 %vm61_vm0, %v99_v29 }
  0xba   :  { %v1167_v30 = vsel %vm90_vm2, 1.0, %v1526_v26 }
  0xbb   :  { %v100_v31 = vmul.f32 %v1168_v24, %v1167_v30 }
  0xbd   :  { %1270 = vmatmul.mubr.msk.f32.vlgmr.msra.gmra.mxu1 %vm61_vm0, %v100_v31 }
 0x17d   :  { %v1271_v33 = vpop.f32.mrf.mxu1 }
 0x17e   :  { %v1643_v34 = vadd.f32 %v1271_v33, %v1169_v32 }
 0x17f   :  { %v181_v35 = vpop.f32.mrf.mxu1 }
 0x180   :  { %204 = vrot.lane.b32.xlu1 %v1643_v34, %s1527_s15  ;;  %v1646_v36 = vadd.f32 %v1169_v32, %v181_v35 }
 0x182   :  { %v234_v26 = vmul.f32 %v210_v21, %v1646_v36  ;;  %v217_v21 = vld [vmem:[%s2028_s7 + $0x38] sm:$0xff] }
 0x184   :  { %194 = vrot.lane.b32.xlu1 %v1646_v36, %s1527_s15  ;;  %s1534_s15 = smov 124  }
 0x188   :  { %339 = vrot.lane.b32.xlu1 %v1643_v34, %s1528_s16 }
 0x18c   :  { %351 = vrot.lane.b32.xlu1 %v1643_v34, %s1529_s17 }
 0x1f2   :  { %v1651_v37 = vpop.permute.xlu1 %204 }
 0x1f3   :  { %341 = vrot.lane.b32.xlu0 %v1651_v37, %s1528_s16  ;;  %353 = vrot.lane.b32.xlu1 %v1651_v37, %s1529_s17 }
 0x1f6   :  { %v1655_v38 = vpop.permute.xlu1 %194 }
 0x1f7   :  { %347 = vrot.lane.b32.xlu0 %v1646_v36, %s1529_s17  ;;  %337 = vrot.lane.b32.xlu1 %v1655_v38, %s1528_s16 }
 0x1fa   :  { %v340_v43 = vpop.permute.xlu1 %339 }
 0x1fb   :  { %349 = vrot.lane.b32.xlu1 %v1655_v38, %s1529_s17  ;;  %s1539_s17 = smov [#allocation6]  }
 0x1fc   :  { %s1152_s18 = sshll.u32 %s1539_s17, 4  ;;  %s1153_s18 = int_to_ptr.vmem [resolvable:$true] %s1152_s18 }
 0x1fd   :  { %p1506_p6 = scmp.lt.s32.totalorder %s1153_s18, %s1153_s18 }
 0x1fe   :  { %v352_v44 = vpop.permute.xlu1 %351 }
 0x1ff   :  { %335 = vrot.lane.b32.xlu1 %v1646_v36, %s1528_s16  ;;  %v361_v51 = vsel %vm290_vm3, %v340_v43, %v352_v44  ;;  %s1535_s16 = smov 112   ;;  %v220_v44 = vld [vmem:[%s2028_s7 + $0x50] sm:$0xff] }
 0x200   :  { %v365_v53 = vmul.f32 %v361_v51, %v232_v50  ;;  %v221_v51 = vld [vmem:[%s2028_s7 + $0x58] sm:$0xff] }
 0x203   :  { %325 = vrot.lane.b32.xlu1 %v229_v39, %s1530_s9 }
 0x207   :  { %323 = vrot.lane.b32.xlu1 %v228_v40, %s1530_s9 }
 0x20b   :  { %321 = vrot.lane.b32.xlu1 %v227_v41, %s1530_s9 }
 0x20f   :  { %319 = vrot.lane.b32.xlu1 %v226_v42, %s1530_s9 }
 0x213   :  { %191 = vrot.lane.b32.xlu1 %v1646_v36, %s1531_s25 }
 0x217   :  { %201 = vrot.lane.b32.xlu1 %v1643_v34, %s1531_s25 }
 0x21b   :  { %266 = vrot.lane.b32.xlu1 %v1646_v36, %s1532_s26 }
 0x265   :  { %v342_v46 = vpop.permute.xlu0 %341  ;;  %v354_v47 = vpop.permute.xlu1 %353 }
 0x266   :  { %v362_v48 = vsel %vm290_vm3, %v342_v46, %v354_v47  ;;  %v211_v46 = vld [vmem:[%s2028_s7 + $0x8] sm:$0xff] }
 0x267   :  { %v366_v49 = vmul.f32 %v362_v48, %v233_v45 }
 0x269   :  { %377 = vrot.lane.b32.xlu0 %v366_v49, %s1530_s9  ;;  %v338_v52 = vpop.permute.xlu1 %337  ;;  %v348_v59 = vpop.permute.xlu0 %347  ;;  %v212_v49 = vld [vmem:[%s2028_s7 + $0x10] sm:$0xff] }
 0x26d   :  { %375 = vrot.lane.b32.xlu0 %v365_v53, %s1530_s9  ;;  %v350_v55 = vpop.permute.xlu1 %349 }
 0x26e   :  { %v360_v56 = vsel %vm290_vm3, %v338_v52, %v350_v55  ;;  %v222_v55 = vld [vmem:[%s2028_s7 + $0x60] sm:$0xff] }
 0x26f   :  { %v364_v57 = vmul.f32 %v360_v56, %v231_v54 }
 0x271   :  { %373 = vrot.lane.b32.xlu0 %v364_v57, %s1530_s9  ;;  %v336_v60 = vpop.permute.xlu1 %335  ;;  %v213_v57 = vld [vmem:[%s2028_s7 + $0x18] sm:$0xff] }
 0x272   :  { %v359_v61 = vsel %vm290_vm3, %v336_v60, %v348_v59 }
 0x273   :  { %v363_v62 = vmul.f32 %v359_v61, %v230_v58  ;;  %v236_v58 = vmul.f32 %v212_v49, %v1655_v38 }
 0x275   :  { %371 = vrot.lane.b32.xlu0 %v363_v62, %s1530_s9  ;;  %v326_v63 = vpop.permute.xlu1 %325  ;;  %v214_v62 = vld [vmem:[%s2028_s7 + $0x20] sm:$0xff] }
 0x276   :  { %v334_v6 = vmul.f32 %v326_v63, %v1651_v37 }
 0x279   :  { %197 = vrot.lane.b32.xlu0 %v1646_v36, %s1533_s14  ;;  %v324_v2 = vpop.permute.xlu1 %323 }
 0x27a   :  { %v333_v9 = vmul.f32 %v324_v2, %v1643_v34 }
 0x27d   :  { %207 = vrot.lane.b32.xlu0 %v1643_v34, %s1533_s14  ;;  %v322_v3 = vpop.permute.xlu1 %321  ;;  %s1184_s14 = sld [smem:[#allocation3 + $0x1]] }
 0x27e   :  { %v332_v17 = vmul.f32 %v322_v3, %v1655_v38  ;;  %v223_v3 = vld [vmem:[%s2028_s7 + $0x68] sm:$0xff] }
 0x281   :  { %242 = vrot.lane.b32.xlu0 %v1646_v36, %s1534_s15  ;;  %v320_v4 = vpop.permute.xlu1 %319 }
 0x282   :  { %v331_v13 = vmul.f32 %v320_v4, %v1646_v36 }
 0x285   :  { %v1705_v5 = vpop.permute.xlu1 %191 }
 0x286   :  { %268 = vrot.lane.b32.xlu1 %v1705_v5, %s1532_s26  ;;  %244 = vrot.lane.b32.xlu0 %v1705_v5, %s1534_s15  ;;  %v235_v54 = vmul.f32 %v211_v46, %v1705_v5 }
 0x289   :  { %v1723_v18 = vpop.permute.xlu1 %201 }
 0x28a   :  { %246 = vrot.lane.b32.xlu1 %v1655_v38, %s1534_s15  ;;  %270 = vrot.lane.b32.xlu0 %v1655_v38, %s1532_s26 }
 0x28d   :  { %v267_v23 = vpop.permute.xlu1 %266 }
 0x2db   :  { %v378_v7 = vpop.permute.xlu0 %377 }
 0x2dc   :  { %v386_v8 = vadd.f32 %v378_v7, %v334_v6  ;;  %v215_v6 = vld [vmem:[%s2028_s7 + $0x28] sm:$0xff]  ;;  %v238_v7 = vmul.f32 %v214_v62, %v1643_v34 }
 0x2de   :  { %397 = vrot.lane.b32.xlu1 %v386_v8, %s1535_s16 }
 0x2df   :  { %v376_v10 = vpop.permute.xlu0 %375 }
 0x2e0   :  { %v385_v11 = vadd.f32 %v376_v10, %v333_v9 }
 0x2e2   :  { %395 = vrot.lane.b32.xlu0 %v385_v11, %s1535_s16  ;;  %v216_v11 = vld [vmem:[%s2028_s7 + $0x30] sm:$0xff] }
 0x2e3   :  { %v374_v12 = vpop.permute.xlu0 %373 }
 0x2e4   :  { %v384_v19 = vadd.f32 %v374_v12, %v332_v17  ;;  %v224_v12 = vld [vmem:[%s2028_s7 + $0x70] sm:$0xff] }
 0x2e7   :  { %v372_v14 = vpop.permute.xlu0 %371 }
 0x2e8   :  { %v383_v15 = vadd.f32 %v372_v14, %v331_v13 }
 0x2ea   :  { %391 = vrot.lane.b32.xlu0 %v383_v15, %s1535_s16  ;;  %v239_v15 = vmul.f32 %v215_v6, %v1723_v18  ;;  %v1858_v6 = vstv %s1184_s14 }
 0x2eb   :  { %v1718_v16 = vpop.permute.xlu0 %197 }
 0x2ec   :  { %248 = vrot.lane.b32.xlu1 %v1718_v16, %s1534_s15  ;;  %v237_v5 = vmul.f32 %v213_v57, %v1718_v16 }
 0x2ee   :  { %272 = vrot.lane.b32.xlu0 %v1718_v16, %s1532_s26 }
 0x2ef   :  { %v1727_v20 = vpop.permute.xlu0 %207 }
 0x2f0   :  { %393 = vrot.lane.b32.xlu1 %v384_v19, %s1535_s16 }
 0x2f2   :  { %274 = vrot.lane.b32.xlu0 %v1643_v34, %s1532_s26 }
 0x2f3   :  { %v243_v24 = vpop.permute.xlu0 %242 }
 0x2f4   :  { %v291_v25 = vsel %vm290_vm3, %v243_v24, %v267_v23  ;;  %250 = vrot.lane.b32.xlu1 %v1643_v34, %s1534_s15  ;;  %v225_v23 = vld [vmem:[%s2028_s7 + $0x78] sm:$0xff] }
 0x2f5   :  { %v299_v27 = vmul.f32 %v291_v25, %v218_v22 }
 0x2f6   :  { %276 = vrot.lane.b32.xlu0 %v1723_v18, %s1532_s26 }
 0x2f7   :  { %v307_v28 = vadd.f32 %v299_v27, %v234_v26 }
 0x2f8   :  { %252 = vrot.lane.b32.xlu1 %v1723_v18, %s1534_s15  ;;  %v269_v29 = vpop.permute.xlu1 %268  ;;  %v245_v30 = vpop.permute.xlu0 %244 }
 0x2f9   :  { %1280 = vmatprep.mubr.msk.f32.mxu1 %vm399_vm4, %v307_v28  ;;  %v292_v42 = vsel %vm290_vm3, %v245_v30, %v269_v29 }
 0x2fa   :  { %278 = vrot.lane.b32.xlu0 %v1651_v37, %s1532_s26 }
 0x2fc   :  { %254 = vrot.lane.b32.xlu1 %v1651_v37, %s1534_s15  ;;  %v247_v31 = vpop.permute.xlu1 %246  ;;  %v271_v32 = vpop.permute.xlu0 %270 }
 0x2fd   :  { %v293_v45 = vsel %vm290_vm3, %v247_v31, %v271_v32 }
 0x2fe   :  { %280 = vrot.lane.b32.xlu0 %v1727_v20, %s1532_s26  ;;  %v301_v50 = vmul.f32 %v293_v45, %v220_v44  ;;  %v539_v44 = vld [vmem:[%s2029_s8 + $0x10] sm:$0xff]  ;;  %s1538_s26 = smov 24  }
 0x300   :  { %256 = vrot.lane.b32.xlu1 %v1727_v20, %s1534_s15  ;;  %v309_v63 = vadd.f32 %v301_v50, %v236_v58 }
 0x302   :  { %617 = vrot.lane.b32.xlu0 %v1643_v34, %s1536_s21  ;;  %v240_v34 = vmul.f32 %v216_v11, %v1651_v37 }
 0x304   :  { %619 = vrot.lane.b32.xlu1 %v1651_v37, %s1536_s21  ;;  %v241_v37 = vmul.f32 %v217_v21, %v1727_v20  ;;  %v538_v20 = vld [vmem:[%s2029_s8 + $0x8] sm:$0xff] }
 0x306   :  { %613 = vrot.lane.b32.xlu0 %v1646_v36, %s1536_s21  ;;  %v219_v36 = vld [vmem:[%s2028_s7 + $0x48] sm:$0xff]  ;;  %s553_s7 = sld [smem:[#allocation3]] }
 0x307   :  { %v300_v48 = vmul.f32 %v292_v42, %v219_v36 }
 0x308   :  { %615 = vrot.lane.b32.xlu1 %v1655_v38, %s1536_s21 }
 0x309   :  { %v308_v60 = vadd.f32 %v300_v48, %v235_v54 }
 0x350   :  { %v398_v33 = vpop.permute.xlu1 %397 }
 0x351   :  { %1272 = vmatprep.subr.msk.mxu1 %vm399_vm4, %v398_v33 }
 0x352   :  { %1273 = vmatpush3.xpose.msk.msra.mxu1 %vm399_vm4, %v398_v33  ;;  %v537_v33 = vld [vmem:[%s2029_s8] sm:$0xff] }
 0x354   :  { %v396_v35 = vpop.permute.xlu0 %395 }
 0x355   :  { %1274 = vmatprep.subr.msk.mxu1 %vm399_vm4, %v396_v35 }
 0x356   :  { %1275 = vmatpush3.xpose.msk.msra.mxu1 %vm399_vm4, %v396_v35 }
 0x35c   :  { %v392_v39 = vpop.permute.xlu0 %391 }
 0x35e   :  { %v249_v40 = vpop.permute.xlu1 %248 }
 0x360   :  { %v273_v41 = vpop.permute.xlu0 %272 }
 0x361   :  { %v294_v52 = vsel %vm290_vm3, %v249_v40, %v273_v41  ;;  %v540_v41 = vld [vmem:[%s2029_s8 + $0x18] sm:$0xff] }
 0x362   :  { %v394_v43 = vpop.permute.xlu1 %393  ;;  %v302_v61 = vmul.f32 %v294_v52, %v221_v51 }
 0x363   :  { %1276 = vmatprep.subr.msk.mxu1 %vm399_vm4, %v394_v43 }
 0x364   :  { %v275_v47 = vpop.permute.xlu0 %274  ;;  %1277 = vmatpush3.xpose.msk.msra.mxu1 %vm399_vm4, %v394_v43  ;;  %v310_v9 = vadd.f32 %v302_v61, %v237_v5 }
 0x365   :  { %1278 = vmatprep.subr.msk.mxu1 %vm399_vm4, %v392_v39 }
 0x366   :  { %v251_v53 = vpop.permute.xlu1 %250 }
 0x367   :  { %v295_v56 = vsel %vm290_vm3, %v251_v53, %v275_v47  ;;  %v542_v53 = vld [vmem:[%s2029_s8 + $0x28] sm:$0xff] }
 0x368   :  { %v277_v59 = vpop.permute.xlu0 %276  ;;  %1279 = vmatpush3.xpose.msk.msra.mxu1 %vm399_vm4, %v392_v39  ;;  %v303_v2 = vmul.f32 %v295_v56, %v222_v55  ;;  %v1835_v39 = vstv %s553_s7 }
 0x36a   :  { %v253_v4 = vpop.permute.xlu1 %252  ;;  %v311_v13 = vadd.f32 %v303_v2, %v238_v7 }
 0x36b   :  { %v296_v38 = vsel %vm290_vm3, %v253_v4, %v277_v59  ;;  %1281 = vmatmul.mubr.msk.f32.vlgmr.msra.gmra.mxu1 %vm399_vm4, %v308_v60  ;;  %v541_v59 = vld [vmem:[%s2029_s8 + $0x20] sm:$0xff]  ;;  %v544_v4 = vld [vmem:[%s2029_s8 + $0x38] sm:$0xff] }
 0x36c   :  { %v279_v8 = vpop.permute.xlu0 %278  ;;  %1283 = vmatprep.mubr.msk.f32.mxu1 %vm399_vm4, %v309_v63  ;;  %v304_v10 = vmul.f32 %v296_v38, %v223_v3 }
 0x36e   :  { %v255_v14 = vpop.permute.xlu1 %254  ;;  %v312_v22 = vadd.f32 %v304_v10, %v239_v15 }
 0x36f   :  { %v297_v16 = vsel %vm290_vm3, %v255_v14, %v279_v8  ;;  %1284 = vmatmul.mubr.msk.f32.gmra.mxu1 %vm399_vm4, %v310_v9 }
 0x370   :  { %v305_v17 = vmul.f32 %v297_v16, %v224_v12  ;;  %v281_v19 = vpop.permute.xlu0 %280  ;;  %1286 = vmatprep.mubr.msk.f32.mxu1 %vm399_vm4, %v311_v13  ;;  %v543_v16 = vld [vmem:[%s2029_s8 + $0x30] sm:$0xff]  ;;  %s1537_s8 = smov 8  }
 0x372   :  { %v313_v18 = vadd.f32 %v305_v17, %v240_v34  ;;  %v257_v24 = vpop.permute.xlu1 %256 }
 0x373   :  { %v298_v25 = vsel %vm290_vm3, %v257_v24, %v281_v19  ;;  %1287 = vmatmul.mubr.msk.f32.gmra.mxu1 %vm399_vm4, %v312_v22 }
 0x374   :  { %v306_v26 = vmul.f32 %v298_v25, %v225_v23  ;;  %1289 = vmatprep.mubr.msk.f32.mxu1 %vm399_vm4, %v313_v18  ;;  %v618_v28 = vpop.permute.xlu0 %617 }
 0x376   :  { %v314_v27 = vadd.f32 %v306_v26, %v241_v37  ;;  %v620_v29 = vpop.permute.xlu1 %619 }
 0x377   :  { %1292 = vmatprep.subr.mxu0 %v620_v29 }
 0x378   :  { %1290 = vmatmul.mubr.msk.f32.gmra.mxu1 %vm399_vm4, %v314_v27  ;;  %1293 = vmatpush3.msra.mxu0 %v620_v29  ;;  %v614_v31 = vpop.permute.xlu0 %613 }
 0x379   :  { %1294 = vmatprep.subr.mxu0 %v618_v28 }
 0x37a   :  { %1295 = vmatpush3.msra.mxu0 %v618_v28  ;;  %v616_v30 = vpop.permute.xlu1 %615 }
 0x37b   :  { %1296 = vmatprep.subr.mxu0 %v616_v30 }
 0x37c   :  { %1297 = vmatpush3.msra.mxu0 %v616_v30 }
 0x37d   :  { %1298 = vmatprep.subr.mxu0 %v614_v31 }
 0x37e   :  { %1299 = vmatpush3.msra.mxu0 %v614_v31 }
 0x42b   :  { %v1282_v32 = vpop.f32.mrf.mxu1 }
 0x42c   :  { %v546_v35 = vmul.f32 %v1282_v32, %v538_v20 }
 0x42d   :  { %v498_v40 = vpop.f32.mrf.mxu1 }
 0x42e   :  { %v556_v36 = vmax.f32 %v546_v35, 0.0  ;;  %v545_v42 = vmul.f32 %v537_v33, %v498_v40 }
 0x42f   :  { %v1285_v43 = vpop.f32.mrf.mxu1 }
 0x430   :  { %v565_v45 = vmul.f32 %v1835_v39, %v556_v36  ;;  %v555_v46 = vmax.f32 %v545_v42, 0.0  ;;  %v548_v47 = vmul.f32 %v1285_v43, %v540_v41 }
 0x431   :  { %v508_v48 = vpop.f32.mrf.mxu1 }
 0x432   :  { %v573_v49 = vmax.f32 %v565_v45, 0.0  ;;  %v564_v50 = vmul.f32 %v1835_v39, %v555_v46  ;;  %v558_v51 = vmax.f32 %v548_v47, 0.0  ;;  %v547_v52 = vmul.f32 %v539_v44, %v508_v48 }
 0x433   :  { %v1288_v54 = vpop.f32.mrf.mxu1 }
 0x434   :  { %v581_v55 = vmin.f32 %v573_v49, 1.0  ;;  %v572_v56 = vmax.f32 %v564_v50, 0.0  ;;  %v567_v57 = vmul.f32 %v1835_v39, %v558_v51  ;;  %v557_v58 = vmax.f32 %v547_v52, 0.0 }
 0x435   :  { %v550_v60 = vmul.f32 %v1288_v54, %v542_v53  ;;  %v518_v61 = vpop.f32.mrf.mxu1 }
 0x436   :  { %v1852_v62 = vmul.f32 15.0, %v581_v55  ;;  %v580_v63 = vmin.f32 %v572_v56, 1.0  ;;  %v575_v2 = vmax.f32 %v567_v57, 0.0  ;;  %v566_v3 = vmul.f32 %v1835_v39, %v557_v58 }
 0x437   :  { %v560_v5 = vmax.f32 %v550_v60, 0.0  ;;  %v549_v38 = vmul.f32 %v541_v59, %v518_v61 }
 0x438   :  { %v1363_v7 = vcvt.f32.s32 %v1852_v62  ;;  %v1366_v8 = vand.u32 2147483648, %v1852_v62  ;;  %v1862_v9 = vmul.f32 15.0, %v580_v63  ;;  %v583_v10 = vmin.f32 %v575_v2, 1.0  ;;  %v1291_v11 = vpop.f32.mrf.mxu1 }
 0x439   :  { %v574_v12 = vmax.f32 %v566_v3, 0.0  ;;  %v569_v13 = vmul.f32 %v1835_v39, %v560_v5  ;;  %v559_v14 = vmax.f32 %v549_v38, 0.0  ;;  %v552_v15 = vmul.f32 %v1291_v11, %v544_v4 }
 0x43a   :  { %v1364_v34 = vcvt.s32.f32 %v1363_v7  ;;  %v1868_v17 = vmul.f32 15.0, %v583_v10  ;;  %v528_v19 = vpop.f32.mrf.mxu1  ;;  %v1353_v21 = vand.u32 2147483647, %v1862_v9  ;;  %v1355_v22 = vcvt.f32.s32 %v1862_v9 }
 0x43b   :  { %v582_v23 = vmin.f32 %v574_v12, 1.0  ;;  %v577_v18 = vmax.f32 %v569_v13, 0.0  ;;  %v568_v24 = vmul.f32 %v1835_v39, %v559_v14  ;;  %v562_v25 = vmax.f32 %v552_v15, 0.0 }
 0x43c   :  { %v1365_v37 = vand.u32 2147483647, %v1364_v34  ;;  %v1379_v26 = vcvt.f32.s32 %v1868_v17  ;;  %v1382_v27 = vand.u32 2147483648, %v1868_v17  ;;  %v551_v28 = vmul.f32 %v543_v16, %v528_v19 }
 0x43d   :  { %v1875_v29 = vmul.f32 15.0, %v582_v23  ;;  %v585_v30 = vmin.f32 %v577_v18, 1.0  ;;  %v576_v31 = vmax.f32 %v568_v24, 0.0  ;;  %v571_v20 = vmul.f32 %v1835_v39, %v562_v25 }
 0x43e   :  { %v1380_v32 = vcvt.s32.f32 %v1379_v26  ;;  %v561_v33 = vmax.f32 %v551_v28, 0.0  ;;  %vm1878_vm5 = vcmp.lt.f32.partialorder %v1353_v21, 8388608.0  ;;  %v1356_v40 = vcvt.s32.f32 %v1355_v22 }
 0x43f   :  { %v1371_v41 = vcvt.f32.s32 %v1875_v29  ;;  %v1374_v36 = vand.u32 2147483648, %v1875_v29  ;;  %v1884_v42 = vmul.f32 15.0, %v585_v30  ;;  %v584_v43 = vmin.f32 %v576_v31, 1.0 }
 0x440   :  { %v1381_v44 = vand.u32 2147483647, %v1380_v32  ;;  %v579_v45 = vmax.f32 %v571_v20, 0.0  ;;  %v570_v46 = vmul.f32 %v1835_v39, %v561_v33  ;;  %v1357_v47 = vand.u32 2147483647, %v1356_v40 }
 0x441   :  { %v1372_v48 = vcvt.s32.f32 %v1371_v41  ;;  %v1395_v49 = vcvt.f32.s32 %v1884_v42  ;;  %v1398_v50 = vand.u32 2147483648, %v1884_v42  ;;  %v592_v51 = vmul.f32 15.0, %v584_v43 }
 0x442   :  { %v587_v52 = vmin.f32 %v579_v45, 1.0  ;;  %v578_v53 = vmax.f32 %v570_v46, 0.0  ;;  %v1358_v54 = vand.u32 2147483648, %v1862_v9  ;;  %v1361_v55 = vand.u32 2147483647, %v1852_v62 }
 0x443   :  { %v1373_v56 = vand.u32 2147483647, %v1372_v48  ;;  %v1396_v57 = vcvt.s32.f32 %v1395_v49  ;;  %v1387_v58 = vcvt.f32.s32 %v592_v51  ;;  %v1390_v59 = vand.u32 2147483648, %v592_v51  ;;  %v811_v48 = vld [vmem:[%s2025_s4 + $0x10] sm:$0xff] }
 0x444   :  { %v595_v60 = vmul.f32 15.0, %v587_v52  ;;  %v586_v61 = vmin.f32 %v578_v53, 1.0  ;;  %v1359_v39 = vor.u32 %v1358_v54, %v1357_v47  ;;  %vm1891_vm6 = vcmp.lt.f32.partialorder %v1361_v55, 8388608.0  ;;  %v812_v47 = vld [vmem:[%s2025_s4 + $0x18] sm:$0xff]  ;;  %v809_v55 = vld [vmem:[%s2025_s4] sm:$0xff] }
 0x445   :  { %v1397_v2 = vand.u32 2147483647, %v1396_v57  ;;  %v1388_v3 = vcvt.s32.f32 %v1387_v58  ;;  %v1367_v4 = vor.u32 %v1366_v8, %v1365_v37  ;;  %v1369_v5 = vand.u32 2147483647, %v1875_v29  ;;  %1312 = vmatprep.subr.mxu0 %v812_v47 }
 0x446   :  { %v1411_v38 = vcvt.f32.s32 %v595_v60  ;;  %v1414_v7 = vand.u32 2147483648, %v595_v60  ;;  %v594_v10 = vmul.f32 15.0, %v586_v61  ;;  %v1360_v11 = vsel %vm1878_vm5, %v1359_v39, %v1862_v9 }
 0x447   :  { %v1389_v12 = vand.u32 2147483647, %v1388_v3  ;;  %v605_v13 = vmul.f32 %v1360_v11, %v1858_v6  ;;  %v1368_v14 = vsel %vm1891_vm6, %v1367_v4, %v1852_v62  ;;  %vm1903_vm7 = vcmp.lt.f32.partialorder %v1369_v5, 8388608.0 }
 0x448   :  { %v1412_v8 = vcvt.s32.f32 %v1411_v38  ;;  %v1403_v16 = vcvt.f32.s32 %v594_v10  ;;  %v1406_v34 = vand.u32 2147483648, %v594_v10  ;;  %v606_v19 = vmul.f32 %v1368_v14, %v1858_v6 }
 0x449   :  { %1300 = vmatprep.mubr.msk.f32.mxu0 %vm61_vm0, %v605_v13  ;;  %v1375_v21 = vor.u32 %v1374_v36, %v1373_v56  ;;  %v1377_v9 = vand.u32 2147483647, %v1868_v17  ;;  %v1383_v22 = vor.u32 %v1382_v27, %v1381_v44  ;;  %v1385_v23 = vand.u32 2147483647, %v592_v51 }
 0x44a   :  { %v1413_v18 = vand.u32 2147483647, %v1412_v8  ;;  %v1404_v24 = vcvt.s32.f32 %v1403_v16  ;;  %1301 = vmatmul.mubr.msk.f32.vlgmr.msra.gmra.mxu0 %vm61_vm0, %v606_v19  ;;  %v1391_v62 = vor.u32 %v1390_v59, %v1389_v12  ;;  %v1393_v25 = vand.u32 2147483647, %v1884_v42 }
 0x44b   :  { %v1376_v37 = vsel %vm1903_vm7, %v1375_v21, %v1875_v29  ;;  %vm1378_vm8 = vcmp.lt.f32.partialorder %v1377_v9, 8388608.0  ;;  %vm1386_vm9 = vcmp.lt.f32.partialorder %v1385_v23, 8388608.0  ;;  %v1399_v26 = vor.u32 %v1398_v50, %v1397_v2  ;;  %1313 = vmatpush3.msra.mxu0 %v812_v47 }
 0x44c   :  { %v1405_v28 = vand.u32 2147483647, %v1404_v24  ;;  %v607_v30 = vmul.f32 %v1376_v37, %v1858_v6  ;;  %v1384_v27 = vsel %vm1378_vm8, %v1383_v22, %v1868_v17  ;;  %v1392_v31 = vsel %vm1386_vm9, %v1391_v62, %v592_v51  ;;  %1314 = vmatprep.subr.mxu0 %v811_v48 }
 0x44d   :  { %v608_v20 = vmul.f32 %v1384_v27, %v1858_v6  ;;  %v609_v32 = vmul.f32 %v1392_v31, %v1858_v6  ;;  %vm1394_vm10 = vcmp.lt.f32.partialorder %v1393_v25, 8388608.0  ;;  %v1401_v33 = vand.u32 2147483647, %v594_v10  ;;  %1315 = vmatpush3.msra.mxu0 %v811_v48  ;;  %v1197_v27 = vld [vmem:[%s2022_s1 + $0x4] ss:$0 sm:$0xff] }
 0x44e   :  { %1303 = vmatprep.mubr.msk.f32.mxu0 %vm61_vm0, %v607_v30  ;;  %v1400_v35 = vsel %vm1394_vm10, %v1399_v26, %v1884_v42  ;;  %v1407_v29 = vor.u32 %v1406_v34, %v1405_v28  ;;  %v1409_v40 = vand.u32 2147483647, %v595_v60  ;;  %v1415_v41 = vor.u32 %v1414_v7, %v1413_v18 }
 0x44f   :  { %1304 = vmatmul.mubr.msk.f32.gmra.mxu0 %vm61_vm0, %v608_v20  ;;  %vm1402_vm11 = vcmp.lt.f32.partialorder %v1401_v33, 8388608.0  ;;  %v610_v36 = vmul.f32 %v1400_v35, %v1858_v6  ;;  %v795_v63 = vstv %s1193_s30  ;;  %vm1061_vm7 = vcmask 523264  }
 0x450   :  { %1306 = vmatprep.mubr.msk.f32.mxu0 %vm61_vm0, %v609_v32  ;;  %v1408_v17 = vsel %vm1402_vm11, %v1407_v29, %v594_v10  ;;  %vm1410_vm12 = vcmp.lt.f32.partialorder %v1409_v40, 8388608.0 }
 0x451   :  { %v611_v43 = vmul.f32 %v1408_v17, %v1858_v6  ;;  %v1416_v44 = vsel %vm1410_vm12, %v1415_v41, %v595_v60 }
 0x452   :  { %v612_v42 = vmul.f32 %v1416_v44, %v1858_v6  ;;  %v810_v6 = vld [vmem:[%s2025_s4 + $0x8] sm:$0xff]  ;;  %s1194_s4 = sld [smem:[#allocation3 + $0x3]]  ;;  %v942_v44 = vld [vmem:[%s2026_s5] sm:$0xff] }
 0x453   :  { %1307 = vmatmul.mubr.msk.f32.gmra.mxu0 %vm61_vm0, %v610_v36  ;;  %1316 = vmatprep.subr.mxu0 %v810_v6 }
 0x454   :  { %1309 = vmatprep.mubr.msk.f32.mxu0 %vm61_vm0, %v611_v43  ;;  %1317 = vmatpush3.msra.mxu0 %v810_v6  ;;  %v943_v43 = vld [vmem:[%s2026_s5 + $0x8] sm:$0xff] }
 0x455   :  { %1318 = vmatprep.subr.mxu0 %v809_v55 }
 0x456   :  { %1319 = vmatpush3.msra.mxu0 %v809_v55  ;;  %v928_v55 = vstv %s1199_s19  ;;  %s1501_s19 = scalar_lea.vmem %s1153_s18, 256 }
 0x457   :  { %1310 = vmatmul.mubr.msk.f32.gmra.mxu0 %vm61_vm0, %v612_v42  ;;  %p1502_p5 = scmp.ne.s32.totalorder %s1153_s18, %s1501_s19  ;;  %p1507_p7 = scmp.lt.s32.totalorder %s1501_s19, %s1501_s19 }
 0x458   :  { %v806_v22 = vstv %s1194_s4 }
 0x459   :  { %p1508_p8 = por %p1507_p7, %p1506_p6 }
 0x45b   :  { %p1509_p9 = pnand %p1508_p8, %p1502_p5 }
 0x50a   :  { %v1302_v45 = vpop.f32.mrf.mxu0 }
 0x50b   :  { %756 = vrot.lane.b32.xlu1 %v1302_v45, %s1537_s8 }
 0x50c   :  { %v715_v46 = vpop.f32.mrf.mxu0 }
 0x50d   :  { %754 = vst.msk [vmem:[#allocation2] sm:$0xff] %vm399_vm4, %v715_v46 }
 0x50f   :  { %v1305_v49 = vpop.f32.mrf.mxu0 }
 0x510   :  { %768 = vrot.lane.b32.xlu0 %v1305_v49, %s1538_s26 }
 0x511   :  { %v725_v50 = vpop.f32.mrf.mxu0 }
 0x513   :  { %v1308_v51 = vpop.f32.mrf.mxu0 }
 0x514   :  { %762 = vrot.lane.b32.xlu0 %v725_v50, %s1530_s9  ;;  %775 = vrot.lane.b32.xlu1 %v1308_v51, %s1537_s8  ;;  %v1198_v50 = vld [vmem:[%s2022_s1 + $0x3] ss:$0 sm:$0xff] }
 0x515   :  { %v735_v52 = vpop.f32.mrf.mxu0 }
 0x516   :  { %773 = vst.msk [vmem:[#allocation2 + $0x8] sm:$0xff] %vm399_vm4, %v735_v52 }
 0x517   :  { %v1311_v53 = vpop.f32.mrf.mxu0 }
 0x518   :  { %785 = vrot.lane.b32.xlu0 %v1311_v53, %s1538_s26 }
 0x519   :  { %v745_v54 = vpop.f32.mrf.mxu0 }
 0x51a   :  { %780 = vrot.lane.b32.xlu1 %v745_v54, %s1530_s9 }
 0x57d   :  { %v757_v56 = vpop.permute.xlu1 %756 }
 0x57e   :  { %760 = vst.msk [vmem:[#allocation2] sm:$0xff] %vm759_vm13, %v757_v56 }
 0x582   :  { %v769_v57 = vpop.permute.xlu0 %768 }
 0x586   :  { %v763_v58 = vpop.permute.xlu0 %762  ;;  %v776_v59 = vpop.permute.xlu1 %775 }
 0x587   :  { %766 = vst.msk [vmem:[#allocation2] sm:$0xff] %vm765_vm14, %v763_v58 }
 0x588   :  { %778 = vst.msk [vmem:[#allocation2 + $0x8] sm:$0xff] %vm759_vm13, %v776_v59 }
 0x589   :  { %772 = vst.msk [vmem:[#allocation2] sm:$0xff] %vm771_vm15, %v769_v57 }
 0x58a   :  { %v786_v61 = vpop.permute.xlu0 %785 }
 0x58c   :  { %v781_v60 = vpop.permute.xlu1 %780 }
 0x58d   :  { %783 = vst.msk [vmem:[#allocation2 + $0x8] sm:$0xff] %vm765_vm14, %v781_v60 }
 0x58e   :  { %788 = vst.msk [vmem:[#allocation2 + $0x8] sm:$0xff] %vm771_vm15, %v786_v61 }
 0x590   :  { %v789_v39 = vld [vmem:[#allocation2] sm:$0xff] }
 0x591   :  { %v793_v2 = vmax.f32 %v789_v39, 0.0 }
 0x593   :  { %v796_v3 = vmul.f32 %v795_v63, %v793_v2 }
 0x595   :  { %v798_v4 = vmax.f32 %v796_v3, 0.0  ;;  %v790_v5 = vld [vmem:[#allocation2 + $0x8] sm:$0xff] }
 0x596   :  { %v794_v38 = vmax.f32 %v790_v5, 0.0 }
 0x597   :  { %v800_v7 = vmin.f32 %v798_v4, 1.0 }
 0x598   :  { %v797_v10 = vmul.f32 %v795_v63, %v794_v38 }
 0x599   :  { %v802_v11 = vmul.f32 15.0, %v800_v7 }
 0x59a   :  { %v799_v12 = vmax.f32 %v797_v10, 0.0 }
 0x59b   :  { %v1419_v13 = vcvt.f32.s32 %v802_v11  ;;  %v1417_v8 = vand.u32 2147483647, %v802_v11  ;;  %v1422_v19 = vand.u32 2147483648, %v802_v11 }
 0x59c   :  { %v801_v14 = vmin.f32 %v799_v12, 1.0 }
 0x59d   :  { %v1420_v15 = vcvt.s32.f32 %v1419_v13  ;;  %vm1418_vm1 = vcmp.lt.f32.partialorder %v1417_v8, 8388608.0 }
 0x59e   :  { %v803_v16 = vmul.f32 15.0, %v801_v14 }
 0x59f   :  { %v1421_v34 = vand.u32 2147483647, %v1420_v15 }
 0x5a0   :  { %v1427_v9 = vcvt.f32.s32 %v803_v16  ;;  %v1425_v24 = vand.u32 2147483647, %v803_v16  ;;  %v1430_v37 = vand.u32 2147483648, %v803_v16 }
 0x5a1   :  { %v1423_v21 = vor.u32 %v1422_v19, %v1421_v34 }
 0x5a2   :  { %v1428_v18 = vcvt.s32.f32 %v1427_v9  ;;  %vm1426_vm2 = vcmp.lt.f32.partialorder %v1425_v24, 8388608.0  ;;  %v1055_v24 = vld [vmem:[%s2027_s6 + $0x30] sm:$0xff] }
 0x5a3   :  { %v1424_v23 = vsel %vm1418_vm1, %v1423_v21, %v802_v11 }
 0x5a4   :  { %v807_v62 = vmul.f32 %v1424_v23, %v806_v22  ;;  %v1429_v25 = vand.u32 2147483647, %v1428_v18  ;;  %v1056_v18 = vld [vmem:[%s2027_s6 + $0x38] sm:$0xff] }
 0x5a5   :  { %1334 = vmatprep.subr.mxu0 %v1056_v18 }
 0x5a6   :  { %1320 = vmatprep.mubr.msk.f32.mxu0 %vm61_vm0, %v807_v62  ;;  %v1431_v26 = vor.u32 %v1430_v37, %v1429_v25  ;;  %v1054_v62 = vld [vmem:[%s2027_s6 + $0x28] sm:$0xff]  ;;  %v1053_v25 = vld [vmem:[%s2027_s6 + $0x20] sm:$0xff]  ;;  %v1052_v37 = vld [vmem:[%s2027_s6 + $0x18] sm:$0xff] }
 0x5a8   :  { %v1432_v28 = vsel %vm1426_vm2, %v1431_v26, %v803_v16  ;;  %v1051_v26 = vld [vmem:[%s2027_s6 + $0x10] sm:$0xff] }
 0x5a9   :  { %v808_v30 = vmul.f32 %v1432_v28, %v806_v22  ;;  %v1050_v28 = vld [vmem:[%s2027_s6 + $0x8] sm:$0xff] }
 0x5ab   :  { %1321 = vmatmul.mubr.msk.f32.vlgmr.msra.gmra.mxu0 %vm61_vm0, %v808_v30  ;;  %v1049_v30 = vld [vmem:[%s2027_s6] sm:$0xff]  ;;  %s1205_s6 = sld [smem:[#allocation3 + $0x7]] }
 0x5ac   :  { %1335 = vmatpush3.msra.mxu0 %v1056_v18 }
 0x5ad   :  { %1336 = vmatprep.subr.mxu0 %v1055_v24 }
 0x5ae   :  { %1337 = vmatpush3.msra.mxu0 %v1055_v24 }
 0x5af   :  { %1338 = vmatprep.subr.mxu0 %v1054_v62 }
 0x5b0   :  { %1339 = vmatpush3.msra.mxu0 %v1054_v62 }
 0x5b1   :  { %1340 = vmatprep.subr.mxu0 %v1053_v25 }
 0x5b2   :  { %1341 = vmatpush3.msra.mxu0 %v1053_v25 }
 0x5b3   :  { %1342 = vmatprep.subr.mxu0 %v1052_v37 }
 0x5b4   :  { %1343 = vmatpush3.msra.mxu0 %v1052_v37 }
 0x5b5   :  { %1344 = vmatprep.subr.mxu0 %v1051_v26 }
 0x5b6   :  { %1345 = vmatpush3.msra.mxu0 %v1051_v26 }
 0x5b7   :  { %1346 = vmatprep.subr.mxu0 %v1050_v28 }
 0x5b8   :  { %1347 = vmatpush3.msra.mxu0 %v1050_v28 }
 0x5b9   :  { %1348 = vmatprep.subr.mxu0 %v1049_v30 }
 0x5ba   :  { %1349 = vmatpush3.msra.mxu0 %v1049_v30 }
 0x66b   :  { %v1322_v31 = vpop.f32.mrf.mxu0 }
 0x66c   :  { %v895_v20 = vadd.f32 %v1322_v31, %v1607_v1  ;;  %v945_v1 = vld [vmem:[%s2026_s5 + $0x18] sm:$0xff] }
 0x66d   :  { %v885_v32 = vpop.f32.mrf.mxu0  ;;  %1323 = vmatprep.subr.mxu1 %v945_v1 }
 0x66e   :  { %v1953_v33 = vadd.f32 %v1197_v27, %v895_v20  ;;  %v894_v35 = vadd.f32 %v885_v32, %v1602_v0  ;;  %v944_v0 = vld [vmem:[%s2026_s5 + $0x10] sm:$0xff]  ;;  %1324 = vmatpush3.msra.mxu1 %v945_v1  ;;  %s1200_s5 = sld [smem:[#allocation3 + $0x5]]  ;;  %v1035_v32 = vstv %s1204_s13 }
 0x66f   :  { %1325 = vmatprep.subr.mxu1 %v944_v0 }
 0x670   :  { %v1956_v29 = vadd.f32 %v1197_v27, %v894_v35  ;;  %v903_v40 = vmul.f32 %v1953_v33, %v1953_v33  ;;  %1326 = vmatpush3.msra.mxu1 %v944_v0  ;;  %v1201_v27 = vld [vmem:[%s2024_s3 + $0x1] ss:$0 sm:$0xff] }
 0x671   :  { %1327 = vmatprep.subr.mxu1 %v943_v43 }
 0x672   :  { %v907_v41 = vsel %vm61_vm0, %v903_v40, 0.0  ;;  %v902_v17 = vmul.f32 %v1956_v29, %v1956_v29  ;;  %1328 = vmatpush3.msra.mxu1 %v943_v43 }
 0x673   :  { %908 = vadd.xlane.f32.xlu0 %v907_v41  ;;  %1329 = vmatprep.subr.mxu1 %v942_v44 }
 0x674   :  { %v904_v36 = vsel %vm61_vm0, %v902_v17, 0.0  ;;  %1330 = vmatpush3.msra.mxu1 %v942_v44  ;;  %v939_v21 = vstv %s1200_s5 }
 0x675   :  { %905 = vadd.xlane.f32.xlu1 %v904_v36 }
 0x6fc   :  { %v909_v42 = vpop.xlane.xlu0 %908 }
 0x6fd   :  { %v911_v45 = vmul.f32 0.03125, %v909_v42 }
 0x6fe   :  { %v906_v46 = vpop.xlane.xlu1 %905 }
 0x6ff   :  { %v913_v47 = vadd.f32 1e-05, %v911_v45  ;;  %v910_v48 = vmul.f32 0.03125, %v906_v46 }
 0x701   :  { %1485 = vrsqrt.f32 %v913_v47  ;;  %v912_v49 = vadd.f32 1e-05, %v910_v48 }
 0x703   :  { %1487 = vrsqrt.f32 %v912_v49 }
 0x70e   :  { %v1486_v6 = vpop.eup %1485 }
 0x70f   :  { %v917_v51 = vmul.f32 %v1486_v6, %v1953_v33 }
 0x710   :  { %v1488_v52 = vpop.eup %1487 }
 0x711   :  { %v923_v53 = vmul.f32 %v1198_v50, %v917_v51  ;;  %v916_v54 = vmul.f32 %v1488_v52, %v1956_v29 }
 0x713   :  { %v927_v56 = vmax.f32 %v923_v53, 0.0  ;;  %v922_v57 = vmul.f32 %v1198_v50, %v916_v54 }
 0x715   :  { %v926_v58 = vmax.f32 %v922_v57, 0.0  ;;  %v930_v59 = vmul.f32 %v928_v55, %v927_v56 }
 0x717   :  { %v929_v60 = vmul.f32 %v928_v55, %v926_v58  ;;  %v932_v61 = vmax.f32 %v930_v59, 0.0  ;;  %v1046_v59 = vstv %s1205_s6 }
 0x719   :  { %v931_v39 = vmax.f32 %v929_v60, 0.0  ;;  %v934_v63 = vmin.f32 %v932_v61, 1.0 }
 0x71b   :  { %v933_v2 = vmin.f32 %v931_v39, 1.0  ;;  %v936_v3 = vmul.f32 15.0, %v934_v63  ;;  %v1206_v63 = vld [vmem:[%s2022_s1 + $0x5] ss:$0 sm:$0xff] }
 0x71d   :  { %v935_v4 = vmul.f32 15.0, %v933_v2  ;;  %v1443_v5 = vcvt.f32.s32 %v936_v3  ;;  %v1441_v11 = vand.u32 2147483647, %v936_v3  ;;  %v1446_v14 = vand.u32 2147483648, %v936_v3 }
 0x71f   :  { %v1435_v38 = vcvt.f32.s32 %v935_v4  ;;  %v1444_v7 = vcvt.s32.f32 %v1443_v5  ;;  %v1433_v12 = vand.u32 2147483647, %v935_v4  ;;  %v1438_v8 = vand.u32 2147483648, %v935_v4 }
 0x720   :  { %vm1442_vm3 = vcmp.lt.f32.partialorder %v1441_v11, 8388608.0 }
 0x721   :  { %v1436_v10 = vcvt.s32.f32 %v1435_v38  ;;  %v1445_v13 = vand.u32 2147483647, %v1444_v7  ;;  %vm1434_vm4 = vcmp.lt.f32.partialorder %v1433_v12, 8388608.0 }
 0x723   :  { %v1437_v15 = vand.u32 2147483647, %v1436_v10  ;;  %v1447_v16 = vor.u32 %v1446_v14, %v1445_v13 }
 0x725   :  { %v1439_v34 = vor.u32 %v1438_v8, %v1437_v15  ;;  %v1448_v19 = vsel %vm1442_vm3, %v1447_v16, %v936_v3 }
 0x726   :  { %v941_v23 = vmul.f32 %v1448_v19, %v939_v21 }
 0x727   :  { %v1440_v9 = vsel %vm1434_vm4, %v1439_v34, %v935_v4 }
 0x728   :  { %v940_v22 = vmul.f32 %v1440_v9, %v939_v21 }
 0x72a   :  { %1331 = vmatprep.mubr.msk.f32.mxu1 %vm61_vm0, %v940_v22 }
 0x72b   :  { %1332 = vmatmul.mubr.msk.f32.vlgmr.msra.gmra.mxu1 %vm61_vm0, %v941_v23 }
 0x7eb   :  { %v1333_v31 = vpop.f32.mrf.mxu1 }
 0x7ec   :  { %v1028_v20 = vadd.f32 %v1333_v31, %v1201_v27 }
 0x7ed   :  { %v1022_v35 = vpop.f32.mrf.mxu1 }
 0x7ee   :  { %v1034_v40 = vmax.f32 %v1028_v20, 0.0  ;;  %v1023_v41 = vadd.f32 %v1201_v27, %v1022_v35 }
 0x7f0   :  { %v1037_v17 = vmul.f32 %v1035_v32, %v1034_v40  ;;  %v1033_v36 = vmax.f32 %v1023_v41, 0.0 }
 0x7f2   :  { %v1039_v1 = vmax.f32 %v1037_v17, 0.0  ;;  %v1036_v0 = vmul.f32 %v1035_v32, %v1033_v36 }
 0x7f4   :  { %v1041_v43 = vmin.f32 %v1039_v1, 1.0  ;;  %v1038_v44 = vmax.f32 %v1036_v0, 0.0 }
 0x7f6   :  { %v1043_v42 = vmul.f32 15.0, %v1041_v43  ;;  %v1040_v45 = vmin.f32 %v1038_v44, 1.0 }
 0x7f8   :  { %v1459_v46 = vcvt.f32.s32 %v1043_v42  ;;  %v1042_v47 = vmul.f32 15.0, %v1040_v45  ;;  %v1457_v6 = vand.u32 2147483647, %v1043_v42  ;;  %v1462_v51 = vand.u32 2147483648, %v1043_v42 }
 0x7fa   :  { %v1460_v48 = vcvt.s32.f32 %v1459_v46  ;;  %v1451_v49 = vcvt.f32.s32 %v1042_v47  ;;  %v1449_v53 = vand.u32 2147483647, %v1042_v47  ;;  %v1454_v56 = vand.u32 2147483648, %v1042_v47 }
 0x7fb   :  { %vm1458_vm5 = vcmp.lt.f32.partialorder %v1457_v6, 8388608.0 }
 0x7fc   :  { %v1461_v50 = vand.u32 2147483647, %v1460_v48  ;;  %v1452_v52 = vcvt.s32.f32 %v1451_v49  ;;  %vm1450_vm6 = vcmp.lt.f32.partialorder %v1449_v53, 8388608.0 }
 0x7fe   :  { %v1463_v54 = vor.u32 %v1462_v51, %v1461_v50  ;;  %v1453_v55 = vand.u32 2147483647, %v1452_v52 }
 0x800   :  { %v1455_v57 = vor.u32 %v1454_v56, %v1453_v55  ;;  %v1464_v58 = vsel %vm1458_vm5, %v1463_v54, %v1043_v42 }
 0x801   :  { %v1048_v39 = vmul.f32 %v1464_v58, %v1046_v59 }
 0x802   :  { %v1456_v60 = vsel %vm1450_vm6, %v1455_v57, %v1042_v47 }
 0x803   :  { %v1047_v61 = vmul.f32 %v1456_v60, %v1046_v59 }
 0x805   :  { %1350 = vmatprep.mubr.msk.f32.mxu0 %vm1061_vm7, %v1047_v61 }
 0x806   :  { %1351 = vmatmul.mubr.msk.f32.vlgmr.msra.gmra.mxu0 %vm1061_vm7, %v1048_v39 }
 0x8c6   :  { %v1352_v2 = vpop.f32.mrf.mxu0 }
 0x8c7   :  { %v1140_v3 = vadd.f32 %v1352_v2, %v1206_v63 }
 0x8c8   :  { %v1134_v4 = vpop.f32.mrf.mxu0 }
 0x8c9   :  { %v1144_v5 = vadd.f32 %v1140_v3, %v1953_v33  ;;  %v1135_v38 = vadd.f32 %v1206_v63, %v1134_v4 }
 0x8cb   :  { %1146 = vst.msk [vmem:[#allocation6 + $0x8] sm:$0xff] %vm61_vm0, %v1144_v5  ;;  %v1143_v7 = vadd.f32 %v1135_v38, %v1956_v29 }
 0x8cd   :  { %1145 = vst.msk [vmem:[#allocation6] sm:$0xff] %vm61_vm0, %v1143_v7 }
 0x8ce   :  { %1512 = shalt.err (!%p1509_p9)
}
 0x8cf   :  { %s1540_s1 = smov 128  }
 0x8d0   :  { %1158 = dma.vmem_to_hbm [thread:$0]  %s1153_s18, 256, %s2031_s10, [#allocation4], %s1540_s1, %s1540_s1, %s1537_s8  }
 0x8d1   :  { %1523 = dma.done.wait [#allocation4], 256  }
 0x8d2   :  { %1524 = vsyncadd [#allocation4], 4294967040 }
 0x8d3   :  { %1162 = vsyncpa [#allocation4], 1 }
 0x8d4   :  { %1163 = vsyncpa [#allocation5], 1 }

</bundles_post_ra>
